<compile_context>
chip_gen: v5e
topology: v5e:2x2
jax: 0.10.0
libtpu: 0.0.40
codegen_flags: <defaults>
</compile_context>

<pallas_src>
import functools

import jax
import jax.numpy as jnp
from jax import lax
from jax.experimental import pallas as pl
from jax.experimental.pallas import tpu as pltpu

# Temperature schedule of approxmatch.cu: j = 7 .. -2, level = -4**j, with the
# final level forced to 0.
_LEVELS = tuple(0.0 if j == -2 else -float(4.0 ** j) for j in range(7, -3, -1))


def _fast_recip(x):
    """EUP approx reciprocal + one Newton step (near-f32 accurate, refine on VPU)."""
    y = pl.reciprocal(x, approx=True)
    return y * (2.0 - x * y)


def _emd_kernel(levels_ref, x1_ref, x2t_ref, cost_ref, *, n, m, tb, n_levels):
    """One grid step processes `tb` batch elements.

    levels_ref: (n_levels,) f32 in SMEM — temperature schedule
    x1_ref    : (tb, n, 3)  points of cloud 1
    x2t_ref   : (tb, 3, m)  points of cloud 2, coordinate-major
    cost_ref  : (tb, 8, 128) lane-dense slab holding the per-batch scalar cost
    """
    x1 = x1_ref[...].astype(jnp.float32)    # (tb, n, 3)
    x2t = x2t_ref[...].astype(jnp.float32)  # (tb, 3, m)

    # Pairwise squared distances d2[b, k, l] = ||x1_bk - x2_bl||^2 -> (tb, n, m).
    # Kept in exact difference form (computed once; avoids cancellation that the
    # MXU ||a||^2+||b||^2-2ab identity would introduce into exp(level*d2)).
    d2 = jnp.zeros((tb, n, m), jnp.float32)
    for c in range(3):
        diff = x1[:, :, c:c + 1] - x2t[:, c:c + 1, :]   # (tb,n,1)-(tb,1,m)
        d2 = d2 + diff * diff
    dist = jnp.sqrt(d2)                                  # computed once, reused

    # Saturation multipliers (integer division, as in the CUDA kernel).
    multi_l = float(max(n, m) // n)
    multi_r = float(max(n, m) // m)

    def body(t, carry):
        cost, remain_l, remain_r = carry
        level = levels_ref[t]                                  # SMEM scalar read
        w = jnp.exp(level * d2) * remain_r                     # (tb, n, m) EUP
        suml = 1e-9 + jnp.sum(w, axis=-1, keepdims=True)       # (tb, n, 1)
        w = w * (remain_l * _fast_recip(suml))                 # single (n,m) mul
        ss = 1e-9 + jnp.sum(w, axis=-2, keepdims=True)         # (tb, 1, m)
        r = jnp.minimum(remain_r * _fast_recip(ss), 1.0)       # (tb, 1, m)
        w = w * r
        # matchcost contribution of this level (no persistent match matrix).
        per_row = jnp.sum(w * dist, axis=-1, keepdims=True)    # (tb, n, 1)
        cost = cost + jnp.sum(per_row, axis=-2, keepdims=True) # (tb, 1, 1)
        remain_l = jnp.maximum(
            remain_l - jnp.sum(w, axis=-1, keepdims=True), 0.0)
        # sum(w*r, axis=0) == (ss - 1e-9) * r  -> avoids a second (n,m) reduce.
        remain_r = jnp.maximum(remain_r - (ss - 1e-9) * r, 0.0)
        return cost, remain_l, remain_r

    carry0 = (
        jnp.zeros((tb, 1, 1), jnp.float32),
        jnp.full((tb, n, 1), multi_l, jnp.float32),
        jnp.full((tb, 1, m), multi_r, jnp.float32),
    )
    cost, _, _ = lax.fori_loop(0, n_levels, body, carry0)

    cost_ref[...] = jnp.broadcast_to(cost, (tb, 8, 128))


def _pick_tb(b, max_tb=8):
    """Largest divisor of b that is <= max_tb (batch elements per grid step)."""
    tb = 1
    for cand in range(1, min(b, max_tb) + 1):
        if b % cand == 0:
            tb = cand
    return tb


def emd_batched_cost(xyz1, xyz2, tb=None):
    """Returns per-batch approximate EMD cost, shape (b,), float32."""
    b, n, _ = xyz1.shape
    m = xyz2.shape[1]
    if tb is None:
        tb = _pick_tb(b)
    x2t = jnp.transpose(xyz2, (0, 2, 1))            # (b, 3, m)
    levels = jnp.asarray(_LEVELS, jnp.float32)      # (10,) SMEM table

    kernel = functools.partial(_emd_kernel, n=n, m=m, tb=tb,
                               n_levels=len(_LEVELS))
    out = pl.pallas_call(
        kernel,
        out_shape=jax.ShapeDtypeStruct((b, 8, 128), jnp.float32),
        grid=(b // tb,),
        in_specs=[
            pl.BlockSpec(memory_space=pltpu.MemorySpace.SMEM),   # levels table
            pl.BlockSpec((tb, n, 3), lambda i: (i, 0, 0)),
            pl.BlockSpec((tb, 3, m), lambda i: (i, 0, 0)),
        ],
        out_specs=pl.BlockSpec((tb, 8, 128), lambda i: (i, 0, 0)),
        compiler_params=pltpu.CompilerParams(
            dimension_semantics=("parallel",)),
        # NOTE: at n=m=128 VMEM use is tiny; for much larger point counts set
        # vmem_limit_bytes here (v7x has only 64 MiB physical VMEM).
    )(levels, xyz1.astype(jnp.float32), x2t.astype(jnp.float32))
    return out[:, 0, 0]


class EarthMoverDistance:
    """JAX/Pallas equivalent of the PyTorch EarthMoverDistance module (forward)."""

    def __init__(self, ignore_zeros=False):
        self.ignore_zeros = ignore_zeros  # unused (matches reference module)

    def __call__(self, xyz1, xyz2, transpose=False):
        if xyz1.ndim == 2:
            xyz1 = xyz1[None]
        if xyz2.ndim == 2:
            xyz2 = xyz2[None]
        if transpose:
            xyz1 = jnp.swapaxes(xyz1, 1, 2)
            xyz2 = jnp.swapaxes(xyz2, 1, 2)
        cost = emd_batched_cost(xyz1, xyz2)          # (b,)
        return jnp.mean(cost)
        # TODO(synk): custom backward (emd.matchcost_backward) not implemented;
        # only the forward pass is reproduced here.


def _emd_reference(xyz1, xyz2):
    """Pure-JAX reference of the same algorithm (for validation)."""
    def one(x1, x2):
        n, m = x1.shape[0], x2.shape[0]
        d2 = jnp.sum((x1[:, None, :] - x2[None, :, :]) ** 2, axis=-1)
        remain_l = jnp.full((n, 1), float(max(n, m) // n), jnp.float32)
        remain_r = jnp.full((1, m), float(max(n, m) // m), jnp.float32)
        match = jnp.zeros((n, m), jnp.float32)
        for level in _LEVELS:
            w = jnp.exp(level * d2) * remain_r
            suml = 1e-9 + jnp.sum(w, axis=1, keepdims=True)
            w = (w / suml) * remain_l
            ss = 1e-9 + jnp.sum(w, axis=0, keepdims=True)
            r = jnp.minimum(remain_r / ss, 1.0)
            w = w * r
            match = match + w
            remain_l = jnp.maximum(remain_l - jnp.sum(w, 1, keepdims=True), 0.0)
            remain_r = jnp.maximum(remain_r - jnp.sum(w, 0, keepdims=True), 0.0)
        return jnp.sum(match * jnp.sqrt(d2))

    return jnp.mean(jax.vmap(one)(xyz1.astype(jnp.float32),
                                  xyz2.astype(jnp.float32)))


if __name__ == "__main__":
    key = jax.random.PRNGKey(0)
    k1, k2 = jax.random.split(key)
    b, n, m = 2, 128, 128
    xyz1 = jax.random.normal(k1, (b, n, 3), dtype=jnp.float32)
    xyz2 = jax.random.normal(k2, (b, m, 3), dtype=jnp.float32)

    emd = EarthMoverDistance()
    out = emd(xyz1, xyz2)
    out = jax.block_until_ready(out)

    ref = jax.block_until_ready(_emd_reference(xyz1, xyz2))
    assert jnp.isfinite(out), "non-finite EMD"
    assert jnp.allclose(out, ref, rtol=1e-3, atol=1e-3), (out, ref)

    print("KERNEL_OK")
</pallas_src>

<mosaic_0001>
module attributes {stable_mosaic.version = 11 : i64} {
  func.func @_emd_kernel(%arg0: i32, %arg1: memref<10xf32, #tpu.memory_space<smem>>, %arg2: memref<2x128x3xf32, #tpu.memory_space<vmem>>, %arg3: memref<2x3x128xf32, #tpu.memory_space<vmem>>, %arg4: memref<2x8x128xf32, #tpu.memory_space<vmem>>) attributes {dimension_semantics = [#tpu.dimension_semantics<parallel>], iteration_bounds = array<i64: 1>, scalar_prefetch = 0 : i64, scratch_operands = 0 : i64, tpu.core_type = #tpu.core_type<tc>, window_params = [{transform_indices = @transform_0, window_bounds = array<i64: 10>}, {transform_indices = @transform_1, window_bounds = array<i64: 2, 128, 3>}, {transform_indices = @transform_2, window_bounds = array<i64: 2, 3, 128>}, {transform_indices = @transform_3, window_bounds = array<i64: 2, 8, 128>}]} {
    %c0 = arith.constant 0 : index
    %c0_0 = arith.constant 0 : index
    %c0_1 = arith.constant 0 : index
    %0 = vector.load %arg2[%c0, %c0_0, %c0_1] : memref<2x128x3xf32, #tpu.memory_space<vmem>>, vector<2x128x3xf32>
    %c0_2 = arith.constant 0 : index
    %c0_3 = arith.constant 0 : index
    %c0_4 = arith.constant 0 : index
    %1 = vector.load %arg3[%c0_2, %c0_3, %c0_4] : memref<2x3x128xf32, #tpu.memory_space<vmem>>, vector<2x3x128xf32>
    %cst = arith.constant 0.000000e+00 : f32
    %2 = vector.broadcast %cst : f32 to vector<2x128x128xf32>
    %3 = vector.extract_strided_slice %0 {offsets = [0, 0, 0], sizes = [2, 128, 1], strides = [1, 1, 1]} : vector<2x128x3xf32> to vector<2x128x1xf32>
    %4 = vector.extract_strided_slice %1 {offsets = [0, 0, 0], sizes = [2, 1, 128], strides = [1, 1, 1]} : vector<2x3x128xf32> to vector<2x1x128xf32>
    %5 = vector.broadcast %3 : vector<2x128x1xf32> to vector<2x128x128xf32>
    %6 = vector.broadcast %4 : vector<2x1x128xf32> to vector<2x128x128xf32>
    %7 = arith.subf %5, %6 : vector<2x128x128xf32>
    %8 = arith.mulf %7, %7 : vector<2x128x128xf32>
    %9 = arith.addf %2, %8 : vector<2x128x128xf32>
    %10 = vector.extract_strided_slice %0 {offsets = [0, 0, 1], sizes = [2, 128, 1], strides = [1, 1, 1]} : vector<2x128x3xf32> to vector<2x128x1xf32>
    %11 = vector.extract_strided_slice %1 {offsets = [0, 1, 0], sizes = [2, 1, 128], strides = [1, 1, 1]} : vector<2x3x128xf32> to vector<2x1x128xf32>
    %12 = vector.broadcast %10 : vector<2x128x1xf32> to vector<2x128x128xf32>
    %13 = vector.broadcast %11 : vector<2x1x128xf32> to vector<2x128x128xf32>
    %14 = arith.subf %12, %13 : vector<2x128x128xf32>
    %15 = arith.mulf %14, %14 : vector<2x128x128xf32>
    %16 = arith.addf %9, %15 : vector<2x128x128xf32>
    %17 = vector.extract_strided_slice %0 {offsets = [0, 0, 2], sizes = [2, 128, 1], strides = [1, 1, 1]} : vector<2x128x3xf32> to vector<2x128x1xf32>
    %18 = vector.extract_strided_slice %1 {offsets = [0, 2, 0], sizes = [2, 1, 128], strides = [1, 1, 1]} : vector<2x3x128xf32> to vector<2x1x128xf32>
    %19 = vector.broadcast %17 : vector<2x128x1xf32> to vector<2x128x128xf32>
    %20 = vector.broadcast %18 : vector<2x1x128xf32> to vector<2x128x128xf32>
    %21 = arith.subf %19, %20 : vector<2x128x128xf32>
    %22 = arith.mulf %21, %21 : vector<2x128x128xf32>
    %23 = arith.addf %16, %22 : vector<2x128x128xf32>
    %24 = math.sqrt %23 : vector<2x128x128xf32>
    %cst_5 = arith.constant 0.000000e+00 : f32
    %25 = vector.broadcast %cst_5 : f32 to vector<2x1x1xf32>
    %cst_6 = arith.constant 1.000000e+00 : f32
    %26 = vector.broadcast %cst_6 : f32 to vector<2x128x1xf32>
    %cst_7 = arith.constant 1.000000e+00 : f32
    %27 = vector.broadcast %cst_7 : f32 to vector<2x1x128xf32>
    %c0_i32 = arith.constant 0 : i32
    %c10_i32 = arith.constant 10 : i32
    %28 = arith.addi %c0_i32, %c10_i32 : i32
    %c1_i32 = arith.constant 1 : i32
    %29:3 = scf.for %arg5 = %c0_i32 to %28 step %c1_i32 iter_args(%arg6 = %25, %arg7 = %26, %arg8 = %27) -> (vector<2x1x1xf32>, vector<2x128x1xf32>, vector<2x1x128xf32>)  : i32 {
      %33 = arith.index_cast %arg5 : i32 to index
      %34 = memref.load %arg1[%33] : memref<10xf32, #tpu.memory_space<smem>>
      %35 = vector.broadcast %34 : f32 to vector<2x128x128xf32>
      %36 = arith.mulf %35, %23 : vector<2x128x128xf32>
      %37 = math.exp %36 : vector<2x128x128xf32>
      %38 = vector.broadcast %arg8 : vector<2x1x128xf32> to vector<2x128x128xf32>
      %39 = arith.mulf %37, %38 : vector<2x128x128xf32>
      %cst_12 = arith.constant dense<0.000000e+00> : vector<2x128xf32>
      %40 = vector.multi_reduction <add>, %39, %cst_12 [2] : vector<2x128x128xf32> to vector<2x128xf32>
      %41 = vector.shape_cast %40 : vector<2x128xf32> to vector<2x128x1xf32>
      %cst_13 = arith.constant 9.99999971E-10 : f32
      %42 = vector.broadcast %cst_13 : f32 to vector<2x128x1xf32>
      %43 = arith.addf %42, %41 : vector<2x128x1xf32>
      %44 = tpu.reciprocal %43 {approx = true} : vector<2x128x1xf32> -> vector<2x128x1xf32>
      %45 = arith.mulf %43, %44 : vector<2x128x1xf32>
      %cst_14 = arith.constant 2.000000e+00 : f32
      %46 = vector.broadcast %cst_14 : f32 to vector<2x128x1xf32>
      %47 = arith.subf %46, %45 : vector<2x128x1xf32>
      %48 = arith.mulf %44, %47 : vector<2x128x1xf32>
      %49 = arith.mulf %arg7, %48 : vector<2x128x1xf32>
      %50 = vector.broadcast %49 : vector<2x128x1xf32> to vector<2x128x128xf32>
      %51 = arith.mulf %39, %50 : vector<2x128x128xf32>
      %cst_15 = arith.constant dense<0.000000e+00> : vector<2x128xf32>
      %52 = vector.multi_reduction <add>, %51, %cst_15 [1] : vector<2x128x128xf32> to vector<2x128xf32>
      %53 = vector.shape_cast %52 : vector<2x128xf32> to vector<2x1x128xf32>
      %cst_16 = arith.constant 9.99999971E-10 : f32
      %54 = vector.broadcast %cst_16 : f32 to vector<2x1x128xf32>
      %55 = arith.addf %54, %53 : vector<2x1x128xf32>
      %56 = tpu.reciprocal %55 {approx = true} : vector<2x1x128xf32> -> vector<2x1x128xf32>
      %57 = arith.mulf %55, %56 : vector<2x1x128xf32>
      %cst_17 = arith.constant 2.000000e+00 : f32
      %58 = vector.broadcast %cst_17 : f32 to vector<2x1x128xf32>
      %59 = arith.subf %58, %57 : vector<2x1x128xf32>
      %60 = arith.mulf %56, %59 : vector<2x1x128xf32>
      %61 = arith.mulf %arg8, %60 : vector<2x1x128xf32>
      %cst_18 = arith.constant 1.000000e+00 : f32
      %62 = vector.broadcast %cst_18 : f32 to vector<2x1x128xf32>
      %63 = arith.minimumf %61, %62 : vector<2x1x128xf32>
      %64 = vector.broadcast %63 : vector<2x1x128xf32> to vector<2x128x128xf32>
      %65 = arith.mulf %51, %64 : vector<2x128x128xf32>
      %66 = arith.mulf %65, %24 : vector<2x128x128xf32>
      %cst_19 = arith.constant dense<0.000000e+00> : vector<2x128xf32>
      %67 = vector.multi_reduction <add>, %66, %cst_19 [2] : vector<2x128x128xf32> to vector<2x128xf32>
      %68 = vector.shape_cast %67 : vector<2x128xf32> to vector<2x128x1xf32>
      %cst_20 = arith.constant dense<0.000000e+00> : vector<2x1xf32>
      %69 = vector.multi_reduction <add>, %68, %cst_20 [1] : vector<2x128x1xf32> to vector<2x1xf32>
      %70 = vector.shape_cast %69 : vector<2x1xf32> to vector<2x1x1xf32>
      %71 = arith.addf %arg6, %70 : vector<2x1x1xf32>
      %cst_21 = arith.constant dense<0.000000e+00> : vector<2x128xf32>
      %72 = vector.multi_reduction <add>, %65, %cst_21 [2] : vector<2x128x128xf32> to vector<2x128xf32>
      %73 = vector.shape_cast %72 : vector<2x128xf32> to vector<2x128x1xf32>
      %74 = arith.subf %arg7, %73 : vector<2x128x1xf32>
      %cst_22 = arith.constant 0.000000e+00 : f32
      %75 = vector.broadcast %cst_22 : f32 to vector<2x128x1xf32>
      %76 = arith.maximumf %74, %75 : vector<2x128x1xf32>
      %cst_23 = arith.constant 9.99999971E-10 : f32
      %77 = vector.broadcast %cst_23 : f32 to vector<2x1x128xf32>
      %78 = arith.subf %55, %77 : vector<2x1x128xf32>
      %79 = arith.mulf %78, %63 : vector<2x1x128xf32>
      %80 = arith.subf %arg8, %79 : vector<2x1x128xf32>
      %cst_24 = arith.constant 0.000000e+00 : f32
      %81 = vector.broadcast %cst_24 : f32 to vector<2x1x128xf32>
      %82 = arith.maximumf %80, %81 : vector<2x1x128xf32>
      scf.yield %71, %76, %82 : vector<2x1x1xf32>, vector<2x128x1xf32>, vector<2x1x128xf32>
    }
    %c10_i32_8 = arith.constant 10 : i32
    %30 = vector.shape_cast %29#0 : vector<2x1x1xf32> to vector<2x1x1xf32>
    %31 = vector.broadcast %30 : vector<2x1x1xf32> to vector<2x8x128xf32>
    %c0_9 = arith.constant 0 : index
    %c0_10 = arith.constant 0 : index
    %c0_11 = arith.constant 0 : index
    %32 = vector.load %arg4[%c0_9, %c0_10, %c0_11] : memref<2x8x128xf32, #tpu.memory_space<vmem>>, vector<2x8x128xf32>
    tpu.vector_store %arg4[%c0_9, %c0_10, %c0_11], %31 {strides = array<i32>} : memref<2x8x128xf32, #tpu.memory_space<vmem>>, vector<2x8x128xf32>,
    return
  }
  func.func @transform_0(%arg0: i32) -> i32 {
    %c0_i32 = arith.constant 0 : i32
    %c0_i32_0 = arith.constant 0 : i32
    return %c0_i32 : i32
  }
  func.func @transform_1(%arg0: i32) -> (i32, i32, i32) {
    %c0_i32 = arith.constant 0 : i32
    %c0_i32_0 = arith.constant 0 : i32
    %c0_i32_1 = arith.constant 0 : i32
    return %arg0, %c0_i32, %c0_i32_0 : i32, i32, i32
  }
  func.func @transform_2(%arg0: i32) -> (i32, i32, i32) {
    %c0_i32 = arith.constant 0 : i32
    %c0_i32_0 = arith.constant 0 : i32
    %c0_i32_1 = arith.constant 0 : i32
    return %arg0, %c0_i32, %c0_i32_0 : i32, i32, i32
  }
  func.func @transform_3(%arg0: i32) -> (i32, i32, i32) {
    %c0_i32 = arith.constant 0 : i32
    %c0_i32_0 = arith.constant 0 : i32
    %c0_i32_1 = arith.constant 0 : i32
    return %arg0, %c0_i32, %c0_i32_0 : i32, i32, i32
  }
}

</mosaic_0001>

<bundles_post_ra>
// kernel: tpu_custom_call.1
= control target key start
LH: loop header
LB: loop body
LE: loop exit
PB: predicated region body
PF: predicated region fallthrough
CT: control target
= control target key end

     0   :  { %8 = vsyncpa [#allocation4], 0  ;;  %s4893_s0 = inlined_call_operand.vmem [shape: f32[10], index: 0, kind: input, shape index: {}]   ;;  %s4894_s1 = inlined_call_operand.vmem [shape: f32[2,128,3], index: 1, kind: input, shape index: {}]   ;;  %s4895_s2 = inlined_call_operand.vmem [shape: f32[2,3,128], index: 2, kind: input, shape index: {}]   ;;  %s4896_s3 = inlined_call_operand.hbm [shape: f32[2,8,128], index: 3, kind: output, shape index: {}]  }
   0x1   :  { %9 = vsyncpa [#allocation3], 0  ;;  %s15_s14 = sshll.u32 %s4893_s0, 4  ;;  %s2960_s15 = smov [#allocation2]   ;;  %s16_s14 = int_to_ptr.vmem [resolvable:$true] %s15_s14 }
   0x2   :  { %18 = dma.vmem_to_smem %s16_s14, 16, %s2960_s15, [#allocation4]  }
   0x3   :  { %2808 = dma.done.wait [#allocation4], 16  }
   0x4   :  { %2809 = vsyncadd [#allocation4], 4294967280 }
   0x5   :  { %27 = sfence }
   0x6   :  { %v2993_v0 = vld [vmem:[%s4894_s1 + $0x20] sm:$0xff]  ;;  %v2998_v1 = vld [vmem:[%s4894_s1 + $0x10] sm:$0xff]  ;;  %v2961_v3 = vmov 0   ;;  %v3011_v4 = vld [vmem:[%s4894_s1 + $0x28] sm:$0xff]  ;;  %v2962_v33 = vmov 1   ;;  %v2963_v61 = vmov 2  }
   0x7   :  { %v3003_v2 = vld [vmem:[%s4894_s1] sm:$0xff]  ;;  %2421 = vset.pattern.permute.xlu2 %v2961_v3  ;;  %2420 = vset.pattern.permute.xlu1 %v2961_v3  ;;  %v3016_v5 = vld [vmem:[%s4894_s1 + $0x18] sm:$0xff]  ;;  %v3021_v6 = vld [vmem:[%s4894_s1 + $0x8] sm:$0xff] }
   0x8   :  { %2419 = vset.pattern.permute.xlu0 %v2961_v3  ;;  %84 = vperm.xlu2 %2421, %v2993_v0   ;;  %v3029_v7 = vld [vmem:[%s4894_s1 + $0x40] sm:$0xff]  ;;  %v3034_v8 = vld [vmem:[%s4894_s1 + $0x38] sm:$0xff]  ;;  %v3039_v9 = vld [vmem:[%s4894_s1 + $0x30] sm:$0xff] }
   0x9   :  { %74 = vperm.xlu1 %2420, %v2998_v1   ;;  %64 = vperm.xlu0 %2419, %v3003_v2   ;;  %v3047_v10 = vld [vmem:[%s4894_s1 + $0x58] sm:$0xff]  ;;  %v3052_v11 = vld [vmem:[%s4894_s1 + $0x50] sm:$0xff]  ;;  %v3057_v12 = vld [vmem:[%s4894_s1 + $0x48] sm:$0xff] }
   0xa   :  { %v3065_v13 = vld [vmem:[%s4894_s1 + $0x70] sm:$0xff]  ;;  %v3070_v14 = vld [vmem:[%s4894_s1 + $0x68] sm:$0xff]  ;;  %v3075_v15 = vld [vmem:[%s4894_s1 + $0x60] sm:$0xff] }
   0xb   :  { %v3083_v16 = vld [vmem:[%s4894_s1 + $0x88] sm:$0xff]  ;;  %v3088_v17 = vld [vmem:[%s4894_s1 + $0x80] sm:$0xff]  ;;  %v3093_v18 = vld [vmem:[%s4894_s1 + $0x78] sm:$0xff] }
   0xc   :  { %v3101_v19 = vld [vmem:[%s4894_s1 + $0xa0] sm:$0xff]  ;;  %v3106_v20 = vld [vmem:[%s4894_s1 + $0x98] sm:$0xff]  ;;  %v3111_v21 = vld [vmem:[%s4894_s1 + $0x90] sm:$0xff] }
   0xd   :  { %v3119_v22 = vld [vmem:[%s4894_s1 + $0xb8] sm:$0xff]  ;;  %v3124_v23 = vld [vmem:[%s4894_s1 + $0xb0] sm:$0xff]  ;;  %v3129_v24 = vld [vmem:[%s4894_s1 + $0xa8] sm:$0xff] }
   0xe   :  { %v3137_v25 = vld [vmem:[%s4894_s1 + $0xd0] sm:$0xff]  ;;  %v3142_v26 = vld [vmem:[%s4894_s1 + $0xc8] sm:$0xff]  ;;  %v3147_v27 = vld [vmem:[%s4894_s1 + $0xc0] sm:$0xff] }
   0xf   :  { %v3155_v28 = vld [vmem:[%s4894_s1 + $0xe8] sm:$0xff]  ;;  %v3160_v29 = vld [vmem:[%s4894_s1 + $0xe0] sm:$0xff]  ;;  %v3165_v30 = vld [vmem:[%s4894_s1 + $0xd8] sm:$0xff] }
  0x10   :  { %89 = vperm.xlu2 %2421, %v3011_v4   ;;  %4975 = vst [vmem:[#allocation8_spill] sm:$0xff] %v3155_v28  ;;  %v3173_v31 = vld [vmem:[%s4894_s1 + $0xf8] sm:$0xff]  ;;  %v3178_v32 = vld [vmem:[%s4894_s1 + $0xf0] sm:$0xff]  ;;  %v3260_v58 = vld [vmem:[%s4895_s2] sm:$0x7] }
  0x11   :  { %79 = vperm.xlu1 %2420, %v3016_v5   ;;  %69 = vperm.xlu0 %2419, %v3021_v6   ;;  %4976 = vst [vmem:[#allocation9_spill] sm:$0xff] %v3160_v29  ;;  %v3263_v59 = vperm.slane %v3260_v58, 0  ;;  %v3266_v60 = vperm.slane %v3260_v58, 1 }
  0x12   :  { %4977 = vst [vmem:[#allocation10_spill] sm:$0xff] %v3173_v31 }
  0x13   :  { %4979 = vst [vmem:[#allocation12_spill] sm:$0xff] %v3260_v58 }
  0x18   :  { %104 = vperm.xlu2 %2421, %v3029_v7  }
  0x19   :  { %99 = vperm.xlu1 %2420, %v3034_v8   ;;  %94 = vperm.xlu0 %2419, %v3039_v9  }
  0x20   :  { %119 = vperm.xlu2 %2421, %v3047_v10  }
  0x21   :  { %114 = vperm.xlu1 %2420, %v3052_v11   ;;  %109 = vperm.xlu0 %2419, %v3057_v12  }
  0x28   :  { %134 = vperm.xlu2 %2421, %v3065_v13  }
  0x29   :  { %129 = vperm.xlu1 %2420, %v3070_v14   ;;  %124 = vperm.xlu0 %2419, %v3075_v15  }
  0x30   :  { %149 = vperm.xlu2 %2421, %v3083_v16  }
  0x31   :  { %144 = vperm.xlu1 %2420, %v3088_v17   ;;  %139 = vperm.xlu0 %2419, %v3093_v18  }
  0x38   :  { %164 = vperm.xlu2 %2421, %v3101_v19  }
  0x39   :  { %159 = vperm.xlu1 %2420, %v3106_v20   ;;  %154 = vperm.xlu0 %2419, %v3111_v21  }
  0x40   :  { %179 = vperm.xlu2 %2421, %v3119_v22  }
  0x41   :  { %174 = vperm.xlu1 %2420, %v3124_v23   ;;  %169 = vperm.xlu0 %2419, %v3129_v24  }
  0x48   :  { %194 = vperm.xlu2 %2421, %v3137_v25  }
  0x49   :  { %189 = vperm.xlu1 %2420, %v3142_v26   ;;  %184 = vperm.xlu0 %2419, %v3147_v27  }
  0x50   :  { %209 = vperm.xlu2 %2421, %v3155_v28  }
  0x51   :  { %204 = vperm.xlu1 %2420, %v3160_v29   ;;  %199 = vperm.xlu0 %2419, %v3165_v30  }
  0x58   :  { %2422 = vset.pattern.permute.xlu2 %v2962_v33 }
  0x59   :  { %219 = vperm.xlu1 %2420, %v3173_v31   ;;  %214 = vperm.xlu0 %2419, %v3178_v32  }
  0x5a   :  { %321 = vperm.xlu2 %2422, %v3003_v2  }
  0x61   :  { %2424 = vset.pattern.permute.xlu1 %v2962_v33  ;;  %2423 = vset.pattern.permute.xlu0 %v2962_v33 }
  0x62   :  { %329 = vperm.xlu1 %2424, %v2998_v1   ;;  %333 = vperm.xlu2 %2422, %v3016_v5   ;;  %v3185_v34 = vpop.permute.xlu2 %84 }
  0x63   :  { %325 = vperm.xlu0 %2423, %v3021_v6  }
  0x6a   :  { %337 = vperm.xlu1 %2424, %v2993_v0   ;;  %341 = vperm.xlu2 %2422, %v3011_v4   ;;  %v3190_v35 = vpop.permute.xlu2 %89 }
  0x6b   :  { %345 = vperm.xlu0 %2423, %v3039_v9  }
  0x72   :  { %349 = vperm.xlu1 %2424, %v3034_v8   ;;  %353 = vperm.xlu2 %2422, %v3029_v7   ;;  %v3195_v36 = vpop.permute.xlu2 %104 }
  0x73   :  { %357 = vperm.xlu0 %2423, %v3057_v12  }
  0x7a   :  { %361 = vperm.xlu1 %2424, %v3052_v11   ;;  %365 = vperm.xlu2 %2422, %v3047_v10   ;;  %v3200_v37 = vpop.permute.xlu2 %119 }
  0x7b   :  { %369 = vperm.xlu0 %2423, %v3075_v15   ;;  %v3203_v38 = vpop.permute.xlu1 %74  ;;  %v65_v39 = vpop.permute.xlu0 %64 }
  0x7c   :  { %v224_v62 = vsub.f32 %v65_v39, %v3263_v59 }
  0x7e   :  { %v256_v58 = vmul.f32 %v224_v62, %v224_v62 }
  0x82   :  { %373 = vperm.xlu1 %2424, %v3070_v14   ;;  %377 = vperm.xlu2 %2422, %v3065_v13   ;;  %v3207_v40 = vpop.permute.xlu2 %134 }
  0x83   :  { %381 = vperm.xlu0 %2423, %v3093_v18   ;;  %v80_v41 = vpop.permute.xlu1 %79  ;;  %v3210_v42 = vpop.permute.xlu0 %69 }
  0x8a   :  { %385 = vperm.xlu1 %2424, %v3088_v17   ;;  %389 = vperm.xlu2 %2422, %v3083_v16   ;;  %v3214_v43 = vpop.permute.xlu2 %149 }
  0x8b   :  { %393 = vperm.xlu0 %2423, %v3111_v21   ;;  %v3217_v44 = vpop.permute.xlu1 %99  ;;  %v3219_v45 = vpop.permute.xlu0 %94 }
  0x92   :  { %397 = vperm.xlu1 %2424, %v3106_v20   ;;  %401 = vperm.xlu2 %2422, %v3101_v19   ;;  %v3223_v46 = vpop.permute.xlu2 %164 }
  0x93   :  { %405 = vperm.xlu0 %2423, %v3129_v24   ;;  %v3226_v47 = vpop.permute.xlu1 %114  ;;  %v3228_v48 = vpop.permute.xlu0 %109 }
  0x9a   :  { %409 = vperm.xlu1 %2424, %v3124_v23   ;;  %413 = vperm.xlu2 %2422, %v3119_v22   ;;  %v3232_v49 = vpop.permute.xlu2 %179 }
  0x9b   :  { %417 = vperm.xlu0 %2423, %v3147_v27   ;;  %v3235_v50 = vpop.permute.xlu1 %129  ;;  %v3237_v51 = vpop.permute.xlu0 %124 }
  0xa2   :  { %421 = vperm.xlu1 %2424, %v3142_v26   ;;  %425 = vperm.xlu2 %2422, %v3137_v25   ;;  %v3241_v52 = vpop.permute.xlu2 %194 }
  0xa3   :  { %429 = vperm.xlu0 %2423, %v3165_v30   ;;  %v3244_v53 = vpop.permute.xlu1 %144  ;;  %v3246_v54 = vpop.permute.xlu0 %139 }
  0xaa   :  { %433 = vperm.xlu1 %2424, %v3160_v29   ;;  %437 = vperm.xlu2 %2422, %v3155_v28   ;;  %v3250_v55 = vpop.permute.xlu2 %209 }
  0xab   :  { %441 = vperm.xlu0 %2423, %v3178_v32   ;;  %v3253_v56 = vpop.permute.xlu1 %159  ;;  %v3255_v57 = vpop.permute.xlu0 %154 }
  0xac   :  { %4978 = vst [vmem:[#allocation11_spill] sm:$0xff] %v3253_v56 }
  0xb2   :  { %445 = vperm.xlu1 %2424, %v3173_v31   ;;  %2425 = vset.pattern.permute.xlu2 %v2963_v61  ;;  %v227_v31 = vsub.f32 %v80_v41, %v3263_v59  ;;  %v229_v41 = vsub.f32 %v3190_v35, %v3263_v59  ;;  %v232_v35 = vsub.f32 %v3195_v36, %v3263_v59 }
  0xb3   :  { %2426 = vset.pattern.permute.xlu0 %v2963_v61  ;;  %v3270_v63 = vpop.permute.xlu1 %174  ;;  %547 = vperm.xlu2 %2425, %v3003_v2   ;;  %v3273_v3 = vpop.permute.xlu0 %169  ;;  %v235_v36 = vsub.f32 %v3200_v37, %v3263_v59 }
  0xb4   :  { %551 = vperm.xlu0 %2426, %v3021_v6   ;;  %v322_v33 = vpop.permute.xlu2 %321  ;;  %v259_v62 = vmul.f32 %v227_v31, %v227_v31  ;;  %v261_v31 = vmul.f32 %v229_v41, %v229_v41 }
  0xb5   :  { %v450_v28 = vsub.f32 %v322_v33, %v3266_v60 }
  0xb7   :  { %v482_v29 = vmul.f32 %v450_v28, %v450_v28 }
  0xb9   :  { %v3277_v56 = vadd.f32 %v482_v29, %v256_v58 }
  0xba   :  { %2427 = vset.pattern.permute.xlu1 %v2963_v61 }
  0xbb   :  { %555 = vperm.xlu1 %2427, %v2998_v1   ;;  %v3281_v39 = vpop.permute.xlu1 %189  ;;  %559 = vperm.xlu2 %2425, %v3016_v5   ;;  %v3284_v2 = vpop.permute.xlu0 %184 }
  0xbc   :  { %571 = vperm.xlu0 %2426, %v3039_v9   ;;  %v334_v6 = vpop.permute.xlu2 %333 }
  0xbd   :  { %v453_v33 = vsub.f32 %v334_v6, %v3266_v60 }
  0xbf   :  { %v485_v28 = vmul.f32 %v453_v33, %v453_v33 }
  0xc1   :  { %v3288_v29 = vadd.f32 %v485_v28, %v259_v62  ;;  %v264_v62 = vmul.f32 %v232_v35, %v232_v35  ;;  %v267_v35 = vmul.f32 %v235_v36, %v235_v36  ;;  %v3341_v36 = vld [vmem:[%s4895_s2 + $0x4] sm:$0x7]  ;;  %s4059_s2 = smov 0  }
  0xc3   :  { %563 = vperm.xlu1 %2427, %v2993_v0   ;;  %v3293_v1 = vpop.permute.xlu1 %204  ;;  %567 = vperm.xlu2 %2425, %v3011_v4   ;;  %v3296_v5 = vpop.permute.xlu0 %199 }
  0xc4   :  { %583 = vperm.xlu0 %2426, %v3057_v12   ;;  %v342_v9 = vpop.permute.xlu2 %341 }
  0xc5   :  { %v455_v58 = vsub.f32 %v342_v9, %v3266_v60 }
  0xc7   :  { %v487_v61 = vmul.f32 %v455_v58, %v455_v58 }
  0xc9   :  { %v3300_v6 = vadd.f32 %v487_v61, %v261_v31 }
  0xcb   :  { %575 = vperm.xlu1 %2427, %v3034_v8   ;;  %v3305_v0 = vpop.permute.xlu1 %219  ;;  %579 = vperm.xlu2 %2425, %v3029_v7   ;;  %v3308_v4 = vpop.permute.xlu0 %214  ;;  %v226_v8 = vsub.f32 %v3203_v38, %v3263_v59  ;;  %v225_v7 = vsub.f32 %v3210_v42, %v3263_v59 }
  0xcc   :  { %595 = vperm.xlu0 %2426, %v3075_v15   ;;  %v354_v12 = vpop.permute.xlu2 %353 }
  0xcd   :  { %v458_v33 = vsub.f32 %v354_v12, %v3266_v60  ;;  %v258_v38 = vmul.f32 %v226_v8, %v226_v8  ;;  %v230_v8 = vsub.f32 %v3219_v45, %v3263_v59 }
  0xcf   :  { %v490_v28 = vmul.f32 %v458_v33, %v458_v33  ;;  %v257_v33 = vmul.f32 %v225_v7, %v225_v7 }
  0xd1   :  { %v3312_v41 = vadd.f32 %v490_v28, %v264_v62 }
  0xd3   :  { %587 = vperm.xlu1 %2427, %v3052_v11   ;;  %591 = vperm.xlu2 %2425, %v3047_v10  }
  0xd4   :  { %607 = vperm.xlu0 %2426, %v3093_v18   ;;  %v330_v15 = vpop.permute.xlu1 %329  ;;  %v366_v9 = vpop.permute.xlu2 %365  ;;  %v228_v18 = vsub.f32 %v3185_v34, %v3263_v59 }
  0xd5   :  { %v452_v58 = vsub.f32 %v330_v15, %v3266_v60  ;;  %v461_v31 = vsub.f32 %v366_v9, %v3266_v60  ;;  %v326_v61 = vpop.permute.xlu0 %325  ;;  %v238_v15 = vsub.f32 %v3207_v40, %v3263_v59 }
  0xd6   :  { %v451_v37 = vsub.f32 %v326_v61, %v3266_v60  ;;  %v3350_v61 = vperm.slane %v3341_v36, 0 }
  0xd7   :  { %v484_v12 = vmul.f32 %v452_v58, %v452_v58  ;;  %v493_v11 = vmul.f32 %v461_v31, %v461_v31  ;;  %v270_v31 = vmul.f32 %v238_v15, %v238_v15  ;;  %v233_v15 = vsub.f32 %v3228_v48, %v3263_v59 }
  0xd8   :  { %v483_v10 = vmul.f32 %v451_v37, %v451_v37 }
  0xd9   :  { %v3326_v62 = vadd.f32 %v484_v12, %v258_v38  ;;  %v3328_v42 = vadd.f32 %v493_v11, %v267_v35  ;;  %v262_v38 = vmul.f32 %v230_v8, %v230_v8  ;;  %v3357_v11 = vperm.slane %v3341_v36, 1 }
  0xda   :  { %v3332_v28 = vadd.f32 %v483_v10, %v257_v33  ;;  %v241_v10 = vsub.f32 %v3214_v43, %v3350_v61 }
  0xdb   :  { %599 = vperm.xlu1 %2427, %v3070_v14   ;;  %603 = vperm.xlu2 %2425, %v3065_v13   ;;  %v260_v14 = vmul.f32 %v228_v18, %v228_v18  ;;  %v231_v18 = vsub.f32 %v3217_v44, %v3263_v59 }
  0xdc   :  { %619 = vperm.xlu0 %2426, %v3111_v21   ;;  %v338_v34 = vpop.permute.xlu1 %337  ;;  %v378_v7 = vpop.permute.xlu2 %377 }
  0xdd   :  { %v454_v9 = vsub.f32 %v338_v34, %v3266_v60  ;;  %v464_v40 = vsub.f32 %v378_v7, %v3266_v60  ;;  %v346_v58 = vpop.permute.xlu0 %345  ;;  %v263_v44 = vmul.f32 %v231_v18, %v231_v18 }
  0xde   :  { %v456_v13 = vsub.f32 %v346_v58, %v3266_v60  ;;  %v273_v58 = vmul.f32 %v241_v10, %v241_v10 }
  0xdf   :  { %v486_v37 = vmul.f32 %v454_v9, %v454_v9  ;;  %v496_v35 = vmul.f32 %v464_v40, %v464_v40 }
  0xe0   :  { %v488_v45 = vmul.f32 %v456_v13, %v456_v13  ;;  %v265_v13 = vmul.f32 %v233_v15, %v233_v15 }
  0xe1   :  { %v3352_v12 = vadd.f32 %v486_v37, %v260_v14  ;;  %v3354_v21 = vadd.f32 %v496_v35, %v270_v31  ;;  %v244_v37 = vsub.f32 %v3223_v46, %v3350_v61  ;;  %v234_v35 = vsub.f32 %v3226_v47, %v3263_v59 }
  0xe2   :  { %v3359_v33 = vadd.f32 %v488_v45, %v262_v38  ;;  %v236_v38 = vsub.f32 %v3237_v51, %v3263_v59 }
  0xe3   :  { %611 = vperm.xlu1 %2427, %v3088_v17   ;;  %615 = vperm.xlu2 %2425, %v3083_v16   ;;  %v266_v47 = vmul.f32 %v234_v35, %v234_v35 }
  0xe4   :  { %631 = vperm.xlu0 %2426, %v3129_v24   ;;  %v350_v8 = vpop.permute.xlu1 %349  ;;  %v390_v34 = vpop.permute.xlu2 %389 }
  0xe5   :  { %v457_v7 = vsub.f32 %v350_v8, %v3266_v60  ;;  %v467_v9 = vsub.f32 %v390_v34, %v3357_v11  ;;  %v358_v40 = vpop.permute.xlu0 %357  ;;  %v276_v34 = vmul.f32 %v244_v37, %v244_v37 }
  0xe6   :  { %v459_v43 = vsub.f32 %v358_v40, %v3266_v60 }
  0xe7   :  { %v489_v14 = vmul.f32 %v457_v7, %v457_v7  ;;  %v499_v17 = vmul.f32 %v467_v9, %v467_v9  ;;  %v268_v9 = vmul.f32 %v236_v38, %v236_v38 }
  0xe8   :  { %v491_v16 = vmul.f32 %v459_v43, %v459_v43  ;;  %v247_v43 = vsub.f32 %v3232_v49, %v3350_v61 }
  0xe9   :  { %v3373_v31 = vadd.f32 %v489_v14, %v263_v44  ;;  %v3375_v48 = vadd.f32 %v499_v17, %v273_v58  ;;  %v237_v58 = vsub.f32 %v3235_v50, %v3263_v59  ;;  %v239_v44 = vsub.f32 %v3246_v54, %v3263_v59 }
  0xea   :  { %v3377_v24 = vadd.f32 %v491_v16, %v265_v13  ;;  %v279_v35 = vmul.f32 %v247_v43, %v247_v43  ;;  %v250_v59 = vsub.f32 %v3241_v52, %v3350_v61  ;;  %v253_v43 = vsub.f32 %v3250_v55, %v3350_v61 }
  0xeb   :  { %623 = vperm.xlu1 %2427, %v3106_v20   ;;  %627 = vperm.xlu2 %2425, %v3101_v19   ;;  %v269_v50 = vmul.f32 %v237_v58, %v237_v58  ;;  %v4980_v58 = vld [vmem:[#allocation11_spill] sm:$0xff] }
  0xec   :  { %643 = vperm.xlu0 %2426, %v3147_v27   ;;  %v362_v45 = vpop.permute.xlu1 %361  ;;  %v402_v10 = vpop.permute.xlu2 %401  ;;  %v285_v55 = vmul.f32 %v253_v43, %v253_v43 }
  0xed   :  { %v460_v18 = vsub.f32 %v362_v45, %v3266_v60  ;;  %v470_v15 = vsub.f32 %v402_v10, %v3357_v11  ;;  %v370_v8 = vpop.permute.xlu0 %369  ;;  %v271_v45 = vmul.f32 %v239_v44, %v239_v44  ;;  %v243_v44 = vsub.f32 %v4980_v58, %v3350_v61 }
  0xee   :  { %v462_v46 = vsub.f32 %v370_v8, %v3266_v60 }
  0xef   :  { %v492_v7 = vmul.f32 %v460_v18, %v460_v18  ;;  %v502_v20 = vmul.f32 %v470_v15, %v470_v15  ;;  %v240_v18 = vsub.f32 %v3244_v53, %v3350_v61 }
  0xf0   :  { %v494_v19 = vmul.f32 %v462_v46, %v462_v46 }
  0xf1   :  { %v3391_v40 = vadd.f32 %v492_v7, %v266_v47  ;;  %v3393_v51 = vadd.f32 %v502_v20, %v276_v34  ;;  %v282_v7 = vmul.f32 %v250_v59, %v250_v59  ;;  %v272_v53 = vmul.f32 %v240_v18, %v240_v18 }
  0xf2   :  { %v3395_v27 = vadd.f32 %v494_v19, %v268_v9 }
  0xf3   :  { %635 = vperm.xlu1 %2427, %v3124_v23   ;;  %639 = vperm.xlu2 %2425, %v3119_v22  }
  0xf4   :  { %655 = vperm.xlu0 %2426, %v3165_v30   ;;  %v374_v14 = vpop.permute.xlu1 %373  ;;  %v414_v17 = vpop.permute.xlu2 %413 }
  0xf5   :  { %v463_v13 = vsub.f32 %v374_v14, %v3266_v60  ;;  %v473_v16 = vsub.f32 %v414_v17, %v3357_v11  ;;  %v382_v37 = vpop.permute.xlu0 %381  ;;  %v4981_v14 = vld [vmem:[#allocation9_spill] sm:$0xff]  ;;  %v4982_v17 = vld [vmem:[#allocation8_spill] sm:$0xff] }
  0xf6   :  { %v465_v49 = vsub.f32 %v382_v37, %v3266_v60  ;;  %v242_v60 = vsub.f32 %v3255_v57, %v3350_v61 }
  0xf7   :  { %v495_v38 = vmul.f32 %v463_v13, %v463_v13  ;;  %v505_v23 = vmul.f32 %v473_v16, %v473_v16  ;;  %v245_v13 = vsub.f32 %v3273_v3, %v3350_v61 }
  0xf8   :  { %v497_v22 = vmul.f32 %v465_v49, %v465_v49  ;;  %v274_v9 = vmul.f32 %v242_v60, %v242_v60 }
  0xf9   :  { %v3409_v10 = vadd.f32 %v495_v38, %v269_v50  ;;  %v3411_v54 = vadd.f32 %v505_v23, %v279_v35  ;;  %v275_v23 = vmul.f32 %v243_v44, %v243_v44  ;;  %v277_v59 = vmul.f32 %v245_v13, %v245_v13 }
  0xfa   :  { %v3413_v30 = vadd.f32 %v497_v22, %v271_v45 }
  0xfb   :  { %647 = vperm.xlu1 %2427, %v3142_v26   ;;  %651 = vperm.xlu2 %2425, %v3137_v25  }
  0xfc   :  { %667 = vperm.xlu0 %2426, %v3178_v32   ;;  %v386_v15 = vpop.permute.xlu1 %385  ;;  %v426_v8 = vpop.permute.xlu2 %425 }
  0xfd   :  { %v466_v46 = vsub.f32 %v386_v15, %v3357_v11  ;;  %v476_v34 = vsub.f32 %v426_v8, %v3357_v11  ;;  %v394_v47 = vpop.permute.xlu0 %393  ;;  %v4983_v8 = vld [vmem:[#allocation12_spill] sm:$0xff] }
  0xfe   :  { %v468_v52 = vsub.f32 %v394_v47, %v3357_v11  ;;  %v4984_v47 = vld [vmem:[#allocation10_spill] sm:$0xff] }
  0xff   :  { %v498_v20 = vmul.f32 %v466_v46, %v466_v46  ;;  %v508_v26 = vmul.f32 %v476_v34, %v476_v34  ;;  %v3451_v46 = vperm.slane %v4983_v8, 2  ;;  %v246_v34 = vsub.f32 %v3270_v63, %v3350_v61 }
 0x100   :  { %v500_v25 = vmul.f32 %v468_v52, %v468_v52  ;;  %v248_v52 = vsub.f32 %v3284_v2, %v3350_v61 }
 0x101   :  { %v3427_v19 = vadd.f32 %v498_v20, %v272_v53  ;;  %v3429_v57 = vadd.f32 %v508_v26, %v282_v7  ;;  %v278_v43 = vmul.f32 %v246_v34, %v246_v34 }
 0x102   :  { %v3431_v32 = vadd.f32 %v500_v25, %v274_v9  ;;  %v280_v44 = vmul.f32 %v248_v52, %v248_v52 }
 0x103   :  { %659 = vperm.xlu1 %2427, %v4981_v14   ;;  %663 = vperm.xlu2 %2425, %v4982_v17  }
 0x104   :  { %v398_v16 = vpop.permute.xlu1 %397  ;;  %v438_v37 = vpop.permute.xlu2 %437 }
 0x105   :  { %v469_v49 = vsub.f32 %v398_v16, %v3357_v11  ;;  %v479_v35 = vsub.f32 %v438_v37, %v3357_v11  ;;  %v406_v50 = vpop.permute.xlu0 %405  ;;  %v249_v16 = vsub.f32 %v3281_v39, %v3350_v61  ;;  %v251_v37 = vsub.f32 %v3296_v5, %v3350_v61 }
 0x106   :  { %v471_v38 = vsub.f32 %v406_v50, %v3357_v11 }
 0x107   :  { %v501_v45 = vmul.f32 %v469_v49, %v469_v49  ;;  %v511_v22 = vmul.f32 %v479_v35, %v479_v35 }
 0x108   :  { %v503_v18 = vmul.f32 %v471_v38, %v471_v38 }
 0x109   :  { %v3444_v60 = vadd.f32 %v501_v45, %v275_v23  ;;  %v3446_v15 = vadd.f32 %v511_v22, %v285_v55  ;;  %v281_v45 = vmul.f32 %v249_v16, %v249_v16  ;;  %v283_v22 = vmul.f32 %v251_v37, %v251_v37 }
 0x10a   :  { %v3448_v3 = vadd.f32 %v503_v18, %v277_v59 }
 0x10b   :  { %671 = vperm.xlu1 %2427, %v4984_v47   ;;  %v252_v47 = vsub.f32 %v3293_v1, %v3350_v61 }
 0x10c   :  { %v410_v7 = vpop.permute.xlu1 %409 }
 0x10d   :  { %v472_v53 = vsub.f32 %v410_v7, %v3357_v11  ;;  %v418_v20 = vpop.permute.xlu0 %417  ;;  %v548_v26 = vpop.permute.xlu2 %547  ;;  %v254_v7 = vsub.f32 %v3308_v4, %v3350_v61  ;;  %v255_v4 = vsub.f32 %v3305_v0, %v3350_v61 }
 0x10e   :  { %v474_v9 = vsub.f32 %v418_v20, %v3357_v11  ;;  %v676_v25 = vsub.f32 %v548_v26, %v3451_v46 }
 0x10f   :  { %v504_v58 = vmul.f32 %v472_v53, %v472_v53 }
 0x110   :  { %v506_v14 = vmul.f32 %v474_v9, %v474_v9  ;;  %v708_v17 = vmul.f32 %v676_v25, %v676_v25 }
 0x111   :  { %v3461_v63 = vadd.f32 %v504_v58, %v278_v43  ;;  %v284_v58 = vmul.f32 %v252_v47, %v252_v47 }
 0x112   :  { %v3463_v13 = vadd.f32 %v506_v14, %v280_v44  ;;  %v3466_v2 = vadd.f32 %v708_v17, %v3277_v56  ;;  %v286_v14 = vmul.f32 %v254_v7, %v254_v7 }
 0x114   :  { %4985 = vst [vmem:[#allocation11_spill] sm:$0xff] %v3466_v2  ;;  %2428 = vrsqrt.f32 %v3466_v2  ;;  %v422_v49 = vpop.permute.xlu1 %421  ;;  %vm779_vm0 = vcmp.eq.f32.partialorder %v3466_v2, inf  ;;  %vm781_vm1 = vcmp.eq.f32.partialorder %v3466_v2, 0.0 }
 0x115   :  { %v475_v35 = vsub.f32 %v422_v49, %v3357_v11  ;;  %v430_v50 = vpop.permute.xlu0 %429  ;;  %v560_v38 = vpop.permute.xlu2 %559 }
 0x116   :  { %v477_v55 = vsub.f32 %v430_v50, %v3357_v11  ;;  %v679_v23 = vsub.f32 %v560_v38, %v3451_v46 }
 0x117   :  { %v507_v56 = vmul.f32 %v475_v35, %v475_v35 }
 0x118   :  { %v509_v59 = vmul.f32 %v477_v55, %v477_v55  ;;  %v711_v18 = vmul.f32 %v679_v23, %v679_v23 }
 0x119   :  { %v3476_v39 = vadd.f32 %v507_v56, %v281_v45  ;;  %v287_v56 = vmul.f32 %v255_v4, %v255_v4 }
 0x11a   :  { %v2429_v8 = vpop.eup %2428  ;;  %v3478_v5 = vadd.f32 %v509_v59, %v283_v22  ;;  %v3481_v34 = vadd.f32 %v711_v18, %v3288_v29 }
 0x11b   :  { %v773_v52 = vmul.f32 %v2429_v8, %v3466_v2 }
 0x11c   :  { %4986 = vst [vmem:[#allocation9_spill] sm:$0xff] %v3481_v34  ;;  %2430 = vrsqrt.f32 %v3481_v34  ;;  %v434_v53 = vpop.permute.xlu1 %433  ;;  %vm815_vm2 = vcmp.eq.f32.partialorder %v3481_v34, inf  ;;  %vm817_vm3 = vcmp.eq.f32.partialorder %v3481_v34, 0.0 }
 0x11d   :  { %v774_v20 = vmul.f32 %v2429_v8, %v773_v52  ;;  %v478_v26 = vsub.f32 %v434_v53, %v3357_v11  ;;  %v442_v9 = vpop.permute.xlu0 %441  ;;  %v568_v25 = vpop.permute.xlu2 %567 }
 0x11e   :  { %v480_v43 = vsub.f32 %v442_v9, %v3357_v11  ;;  %v681_v29 = vsub.f32 %v568_v25, %v3451_v46 }
 0x11f   :  { %v775_v44 = vmul.f32 0.5, %v774_v20  ;;  %v510_v1 = vmul.f32 %v478_v26, %v478_v26 }
 0x120   :  { %v512_v17 = vmul.f32 %v480_v43, %v480_v43  ;;  %v713_v16 = vmul.f32 %v681_v29, %v681_v29 }
 0x121   :  { %v776_v37 = vsub.f32 1.5, %v775_v44  ;;  %v3494_v49 = vadd.f32 %v510_v1, %v284_v58 }
 0x122   :  { %v2431_v35 = vpop.eup %2430  ;;  %v3496_v50 = vadd.f32 %v512_v17, %v286_v14  ;;  %v3499_v38 = vadd.f32 %v713_v16, %v3300_v6  ;;  %v782_v6 = vand.u32 2147483648, %v3466_v2 }
 0x123   :  { %v777_v55 = vmul.f32 %v2429_v8, %v776_v37  ;;  %v809_v23 = vmul.f32 %v2431_v35, %v3481_v34 }
 0x124   :  { %4987 = vst [vmem:[#allocation8_spill] sm:$0xff] %v3499_v38  ;;  %2432 = vrsqrt.f32 %v3499_v38  ;;  %v446_v45 = vpop.permute.xlu1 %445  ;;  %vm839_vm4 = vcmp.eq.f32.partialorder %v3499_v38, inf  ;;  %vm841_vm5 = vcmp.eq.f32.partialorder %v3499_v38, 0.0 }
 0x125   :  { %v778_v22 = vmul.f32 %v777_v55, %v3466_v2  ;;  %v810_v59 = vmul.f32 %v2431_v35, %v809_v23  ;;  %v481_v0 = vsub.f32 %v446_v45, %v3357_v11  ;;  %v580_v61 = vpop.permute.xlu2 %579 }
 0x126   :  { %v684_v18 = vsub.f32 %v580_v61, %v3451_v46  ;;  %v552_v8 = vpop.permute.xlu0 %551 }
 0x127   :  { %v780_v47 = vsel %vm779_vm0, %v3466_v2, %v778_v22  ;;  %v811_v52 = vmul.f32 0.5, %v810_v59  ;;  %v513_v7 = vmul.f32 %v481_v0, %v481_v0  ;;  %v677_v53 = vsub.f32 %v552_v8, %v3451_v46 }
 0x128   :  { %v3511_v20 = vsel %vm781_vm1, %v782_v6, %v780_v47  ;;  %v716_v26 = vmul.f32 %v684_v18, %v684_v18 }
 0x129   :  { %4988 = vst [vmem:[#allocation12_spill] sm:$0xff] %v3511_v20  ;;  %v812_v11 = vsub.f32 1.5, %v811_v52  ;;  %v3513_v9 = vadd.f32 %v513_v7, %v287_v56  ;;  %v709_v25 = vmul.f32 %v677_v53, %v677_v53  ;;  %v4045_v20 = vmov 1.0  }
 0x12a   :  { %v2433_v43 = vpop.eup %2432  ;;  %v3516_v29 = vadd.f32 %v716_v26, %v3312_v41  ;;  %v818_v41 = vand.u32 2147483648, %v3481_v34 }
 0x12b   :  { %v813_v58 = vmul.f32 %v2431_v35, %v812_v11  ;;  %v833_v44 = vmul.f32 %v2433_v43, %v3499_v38  ;;  %v3520_v1 = vadd.f32 %v709_v25, %v3332_v28 }
 0x12c   :  { %4989 = vst [vmem:[#allocation10_spill] sm:$0xff] %v3516_v29  ;;  %2434 = vrsqrt.f32 %v3516_v29  ;;  %vm875_vm6 = vcmp.eq.f32.partialorder %v3516_v29, inf  ;;  %vm877_vm7 = vcmp.eq.f32.partialorder %v3516_v29, 0.0 }
 0x12d   :  { %4990 = vst [vmem:[#allocation13_spill] sm:$0xff] %v3520_v1  ;;  %v814_v14 = vmul.f32 %v813_v58, %v3481_v34  ;;  %v834_v17 = vmul.f32 %v2433_v43, %v833_v44  ;;  %2436 = vrsqrt.f32 %v3520_v1  ;;  %v556_v16 = vpop.permute.xlu1 %555  ;;  %v592_v4 = vpop.permute.xlu2 %591  ;;  %vm791_vm8 = vcmp.eq.f32.partialorder %v3520_v1, inf }
 0x12e   :  { %v678_v37 = vsub.f32 %v556_v16, %v3451_v46  ;;  %v687_v35 = vsub.f32 %v592_v4, %v3451_v46  ;;  %v572_v55 = vpop.permute.xlu0 %571  ;;  %v3557_v4 = vperm.slane %v3341_v36, 2  ;;  %vm793_vm9 = vcmp.eq.f32.partialorder %v3520_v1, 0.0 }
 0x12f   :  { %v816_v28 = vsel %vm815_vm2, %v3481_v34, %v814_v14  ;;  %v835_v23 = vmul.f32 0.5, %v834_v17  ;;  %v682_v45 = vsub.f32 %v572_v55, %v3451_v46 }
 0x130   :  { %v3532_v56 = vsel %vm817_vm3, %v818_v41, %v816_v28  ;;  %v710_v22 = vmul.f32 %v678_v37, %v678_v37  ;;  %v719_v59 = vmul.f32 %v687_v35, %v687_v35 }
 0x131   :  { %4991 = vst [vmem:[#allocation14_spill] sm:$0xff] %v3532_v56  ;;  %v836_v0 = vsub.f32 1.5, %v835_v23  ;;  %v714_v61 = vmul.f32 %v682_v45, %v682_v45  ;;  %v878_v23 = vand.u32 2147483648, %v3516_v29  ;;  %v4039_v56 = vmov 1.0  }
 0x132   :  { %v2435_v6 = vpop.eup %2434  ;;  %v3535_v18 = vadd.f32 %v710_v22, %v3326_v62  ;;  %v3538_v8 = vadd.f32 %v719_v59, %v3328_v42  ;;  %v842_v42 = vand.u32 2147483648, %v3499_v38 }
 0x133   :  { %v2437_v47 = vpop.eup %2436  ;;  %v837_v52 = vmul.f32 %v2433_v43, %v836_v0  ;;  %v869_v7 = vmul.f32 %v2435_v6, %v3516_v29  ;;  %v3542_v53 = vadd.f32 %v714_v61, %v3359_v33 }
 0x134   :  { %4992 = vst [vmem:[#allocation15_spill] sm:$0xff] %v3535_v18  ;;  %v785_v26 = vmul.f32 %v2437_v47, %v3520_v1  ;;  %2438 = vrsqrt.f32 %v3535_v18  ;;  %vm803_vm10 = vcmp.eq.f32.partialorder %v3535_v18, inf  ;;  %vm805_vm11 = vcmp.eq.f32.partialorder %v3535_v18, 0.0 }
 0x135   :  { %4993 = vst [vmem:[#allocation16_spill] sm:$0xff] %v3538_v8  ;;  %v838_v11 = vmul.f32 %v837_v52, %v3499_v38  ;;  %v870_v25 = vmul.f32 %v2435_v6, %v869_v7  ;;  %2440 = vrsqrt.f32 %v3538_v8  ;;  %v564_v62 = vpop.permute.xlu1 %563  ;;  %v604_v58 = vpop.permute.xlu2 %603  ;;  %vm911_vm12 = vcmp.eq.f32.partialorder %v3538_v8, inf }
 0x136   :  { %4994 = vst [vmem:[#allocation17_spill] sm:$0xff] %v3542_v53  ;;  %v786_v43 = vmul.f32 %v2437_v47, %v785_v26  ;;  %v584_v44 = vpop.permute.xlu0 %583  ;;  %2442 = vrsqrt.f32 %v3542_v53  ;;  %v680_v37 = vsub.f32 %v564_v62, %v3451_v46  ;;  %v690_v35 = vsub.f32 %v604_v58, %v3451_v46 }
 0x137   :  { %v840_v33 = vsel %vm839_vm4, %v3499_v38, %v838_v11  ;;  %v871_v14 = vmul.f32 0.5, %v870_v25  ;;  %v685_v55 = vsub.f32 %v584_v44, %v3451_v46  ;;  %v794_v62 = vand.u32 2147483648, %v3520_v1 }
 0x138   :  { %v3553_v17 = vsel %vm841_vm5, %v842_v42, %v840_v33  ;;  %v787_v16 = vmul.f32 0.5, %v786_v43  ;;  %v712_v0 = vmul.f32 %v680_v37, %v680_v37  ;;  %v722_v61 = vmul.f32 %v690_v35, %v690_v35 }
 0x139   :  { %4995 = vst [vmem:[#allocation18_spill] sm:$0xff] %v3553_v17  ;;  %v872_v41 = vsub.f32 1.5, %v871_v14  ;;  %v717_v26 = vmul.f32 %v685_v55, %v685_v55  ;;  %vm913_vm13 = vcmp.eq.f32.partialorder %v3538_v8, 0.0  ;;  %vm851_vm14 = vcmp.eq.f32.partialorder %v3542_v53, inf }
 0x13a   :  { %v2439_v28 = vpop.eup %2438  ;;  %v788_v45 = vsub.f32 1.5, %v787_v16  ;;  %v3571_v43 = vadd.f32 %v712_v0, %v3352_v12  ;;  %v3576_v33 = vadd.f32 %v722_v61, %v3354_v21  ;;  %vm853_vm15 = vcmp.eq.f32.partialorder %v3542_v53, 0.0 }
 0x13b   :  { %v2441_v22 = vpop.eup %2440  ;;  %v873_v59 = vmul.f32 %v2435_v6, %v872_v41  ;;  %v797_v36 = vmul.f32 %v2439_v28, %v3535_v18  ;;  %v3583_v41 = vadd.f32 %v717_v26, %v3377_v24  ;;  %v806_v24 = vand.u32 2147483648, %v3535_v18 }
 0x13c   :  { %v789_v52 = vmul.f32 %v2437_v47, %v788_v45  ;;  %v905_v7 = vmul.f32 %v2441_v22, %v3538_v8  ;;  %v2443_v11 = vpop.eup %2442  ;;  %4996 = vst [vmem:[#allocation19_spill] sm:$0xff] %v3571_v43  ;;  %2444 = vrsqrt.f32 %v3571_v43  ;;  %vm827_vm0 = vcmp.eq.f32.partialorder %v3571_v43, inf }
 0x13d   :  { %v874_v25 = vmul.f32 %v873_v59, %v3516_v29  ;;  %v798_v42 = vmul.f32 %v2439_v28, %v797_v36  ;;  %v576_v6 = vpop.permute.xlu1 %575  ;;  %v845_v47 = vmul.f32 %v2443_v11, %v3542_v53  ;;  %4997 = vst [vmem:[#allocation20_spill] sm:$0xff] %v3576_v33  ;;  %2446 = vrsqrt.f32 %v3576_v33  ;;  %v616_v36 = vpop.permute.xlu2 %615 }
 0x13e   :  { %v790_v58 = vmul.f32 %v789_v52, %v3520_v1  ;;  %v906_v44 = vmul.f32 %v2441_v22, %v905_v7  ;;  %4998 = vst [vmem:[#allocation21_spill] sm:$0xff] %v3583_v41  ;;  %v596_v0 = vpop.permute.xlu0 %595  ;;  %2448 = vrsqrt.f32 %v3583_v41  ;;  %v914_v7 = vand.u32 2147483648, %v3538_v8 }
 0x13f   :  { %v876_v14 = vsel %vm875_vm6, %v3516_v29, %v874_v25  ;;  %v799_v16 = vmul.f32 0.5, %v798_v42  ;;  %v846_v35 = vmul.f32 %v2443_v11, %v845_v47  ;;  %v683_v42 = vsub.f32 %v576_v6, %v3451_v46 }
 0x140   :  { %v3587_v12 = vsel %vm877_vm7, %v878_v23, %v876_v14  ;;  %v792_v37 = vsel %vm791_vm8, %v3520_v1, %v790_v58  ;;  %v907_v21 = vmul.f32 0.5, %v906_v44  ;;  %v688_v14 = vsub.f32 %v596_v0, %v3451_v46 }
 0x141   :  { %4999 = vst [vmem:[#allocation22_spill] sm:$0xff] %v3587_v12  ;;  %v3594_v55 = vsel %vm793_vm9, %v794_v62, %v792_v37  ;;  %v800_v45 = vsub.f32 1.5, %v799_v16  ;;  %v847_v23 = vmul.f32 0.5, %v846_v35  ;;  %v854_v37 = vand.u32 2147483648, %v3542_v53 }
 0x142   :  { %5000 = vst [vmem:[#allocation23_spill] sm:$0xff] %v3594_v55  ;;  %v908_v59 = vsub.f32 1.5, %v907_v21  ;;  %v2445_v25 = vpop.eup %2444  ;;  %v715_v21 = vmul.f32 %v683_v42, %v683_v42  ;;  %vm829_vm1 = vcmp.eq.f32.partialorder %v3571_v43, 0.0  ;;  %vm947_vm2 = vcmp.eq.f32.partialorder %v3576_v33, inf }
 0x143   :  { %v801_v61 = vmul.f32 %v2439_v28, %v800_v45  ;;  %v848_v26 = vsub.f32 1.5, %v847_v23  ;;  %v693_v28 = vsub.f32 %v616_v36, %v3557_v4  ;;  %v2447_v45 = vpop.eup %2446  ;;  %vm949_vm3 = vcmp.eq.f32.partialorder %v3576_v33, 0.0 }
 0x144   :  { %v909_v52 = vmul.f32 %v2441_v22, %v908_v59  ;;  %v821_v22 = vmul.f32 %v2445_v25, %v3571_v43  ;;  %v2449_v36 = vpop.eup %2448  ;;  %vm887_vm4 = vcmp.eq.f32.partialorder %v3583_v41, inf  ;;  %vm889_vm5 = vcmp.eq.f32.partialorder %v3583_v41, 0.0 }
 0x145   :  { %v802_v62 = vmul.f32 %v801_v61, %v3535_v18  ;;  %v588_v58 = vpop.permute.xlu1 %587  ;;  %v849_v47 = vmul.f32 %v2443_v11, %v848_v26  ;;  %v725_v35 = vmul.f32 %v693_v28, %v693_v28  ;;  %v941_v61 = vmul.f32 %v2447_v45, %v3576_v33 }
 0x146   :  { %v910_v44 = vmul.f32 %v909_v52, %v3538_v8  ;;  %v822_v23 = vmul.f32 %v2445_v25, %v821_v22  ;;  %v3630_v52 = vadd.f32 %v715_v21, %v3373_v31  ;;  %v881_v42 = vmul.f32 %v2449_v36, %v3583_v41  ;;  %v628_v22 = vpop.permute.xlu2 %627 }
 0x147   :  { %v804_v16 = vsel %vm803_vm10, %v3535_v18, %v802_v62  ;;  %v850_v59 = vmul.f32 %v849_v47, %v3542_v53  ;;  %v720_v28 = vmul.f32 %v688_v14, %v688_v14  ;;  %v686_v31 = vsub.f32 %v588_v58, %v3451_v46 }
 0x148   :  { %v3618_v6 = vsel %vm805_vm11, %v806_v24, %v804_v16  ;;  %v912_v11 = vsel %vm911_vm12, %v3538_v8, %v910_v44  ;;  %5003 = vst [vmem:[#allocation26_spill] sm:$0xff] %v3630_v52  ;;  %v3633_v24 = vadd.f32 %v725_v35, %v3375_v48  ;;  %v823_v62 = vmul.f32 0.5, %v822_v23  ;;  %v608_v16 = vpop.permute.xlu0 %607 }
 0x149   :  { %5001 = vst [vmem:[#allocation24_spill] sm:$0xff] %v3618_v6  ;;  %v3626_v0 = vsel %vm913_vm13, %v914_v7, %v912_v11  ;;  %v852_v26 = vsel %vm851_vm14, %v3542_v53, %v850_v59  ;;  %v942_v44 = vmul.f32 %v2447_v45, %v941_v61  ;;  %2450 = vrsqrt.f32 %v3630_v52 }
 0x14a   :  { %5002 = vst [vmem:[#allocation25_spill] sm:$0xff] %v3626_v0  ;;  %v3641_v7 = vsel %vm853_vm15, %v854_v37, %v852_v26  ;;  %v824_v47 = vsub.f32 1.5, %v823_v62  ;;  %v882_v48 = vmul.f32 %v2449_v36, %v881_v42  ;;  %2452 = vrsqrt.f32 %v3633_v24 }
 0x14b   :  { %5004 = vst [vmem:[#allocation27_spill] sm:$0xff] %v3633_v24  ;;  %v943_v21 = vmul.f32 0.5, %v942_v44  ;;  %v830_v37 = vand.u32 2147483648, %v3571_v43  ;;  %v3650_v59 = vadd.f32 %v720_v28, %v3395_v27  ;;  %v718_v23 = vmul.f32 %v686_v31, %v686_v31 }
 0x14c   :  { %5005 = vst [vmem:[#allocation28_spill] sm:$0xff] %v3641_v7  ;;  %v825_v35 = vmul.f32 %v2445_v25, %v824_v47  ;;  %v883_v11 = vmul.f32 0.5, %v882_v48  ;;  %v696_v61 = vsub.f32 %v628_v22, %v3557_v4  ;;  %v950_v44 = vand.u32 2147483648, %v3576_v33 }
 0x14d   :  { %v600_v14 = vpop.permute.xlu1 %599  ;;  %5006 = vst [vmem:[#allocation29_spill] sm:$0xff] %v3650_v59  ;;  %v944_v58 = vsub.f32 1.5, %v943_v21  ;;  %2454 = vrsqrt.f32 %v3650_v59  ;;  %v3659_v27 = vadd.f32 %v718_v23, %v3391_v40  ;;  %v691_v28 = vsub.f32 %v608_v16, %v3451_v46 }
 0x14e   :  { %v826_v26 = vmul.f32 %v825_v35, %v3571_v43  ;;  %v884_v62 = vsub.f32 1.5, %v883_v11  ;;  %v728_v22 = vmul.f32 %v696_v61, %v696_v61  ;;  %vm863_vm6 = vcmp.eq.f32.partialorder %v3630_v52, inf }
 0x14f   :  { %v2451_v25 = vpop.eup %2450  ;;  %v945_v42 = vmul.f32 %v2447_v45, %v944_v58  ;;  %5007 = vst [vmem:[#allocation30_spill] sm:$0xff] %v3659_v27  ;;  %2456 = vrsqrt.f32 %v3659_v27  ;;  %v723_v23 = vmul.f32 %v691_v28, %v691_v28  ;;  %vm865_vm7 = vcmp.eq.f32.partialorder %v3630_v52, 0.0 }
 0x150   :  { %v828_v31 = vsel %vm827_vm0, %v3571_v43, %v826_v26  ;;  %v885_v47 = vmul.f32 %v2449_v36, %v884_v62  ;;  %v857_v48 = vmul.f32 %v2451_v25, %v3630_v52  ;;  %v2453_v21 = vpop.eup %2452  ;;  %v3681_v58 = vadd.f32 %v728_v22, %v3393_v51  ;;  %v620_v0 = vpop.permute.xlu0 %619 }
 0x151   :  { %v3668_v35 = vsel %vm829_vm1, %v830_v37, %v828_v31  ;;  %v946_v45 = vmul.f32 %v945_v42, %v3576_v33  ;;  %v977_v36 = vmul.f32 %v2453_v21, %v3633_v24  ;;  %v890_v37 = vand.u32 2147483648, %v3583_v41 }
 0x152   :  { %5008 = vst [vmem:[#allocation31_spill] sm:$0xff] %v3668_v35  ;;  %v886_v40 = vmul.f32 %v885_v47, %v3583_v41  ;;  %v858_v16 = vmul.f32 %v2451_v25, %v857_v48  ;;  %v640_v48 = vpop.permute.xlu2 %639  ;;  %2458 = vrsqrt.f32 %v3681_v58  ;;  %vm983_vm8 = vcmp.eq.f32.partialorder %v3633_v24, inf }
 0x153   :  { %v948_v11 = vsel %vm947_vm2, %v3576_v33, %v946_v45  ;;  %5009 = vst [vmem:[#allocation32_spill] sm:$0xff] %v3681_v58  ;;  %v2455_v26 = vpop.eup %2454  ;;  %v978_v47 = vmul.f32 %v2453_v21, %v977_v36  ;;  %v689_v36 = vsub.f32 %v600_v14, %v3451_v46  ;;  %vm985_vm9 = vcmp.eq.f32.partialorder %v3633_v24, 0.0 }
 0x154   :  { %v3687_v62 = vsel %vm949_vm3, %v950_v44, %v948_v11  ;;  %v888_v42 = vsel %vm887_vm4, %v3583_v41, %v886_v40  ;;  %v859_v31 = vmul.f32 0.5, %v858_v16  ;;  %v917_v51 = vmul.f32 %v2455_v26, %v3650_v59 }
 0x155   :  { %v3683_v61 = vpop.permute.xlu1 %611  ;;  %5010 = vst [vmem:[#allocation33_spill] sm:$0xff] %v3687_v62  ;;  %v3690_v45 = vsel %vm889_vm5, %v890_v37, %v888_v42  ;;  %v866_v44 = vand.u32 2147483648, %v3630_v52  ;;  %v979_v22 = vmul.f32 0.5, %v978_v47  ;;  %v2457_v11 = vpop.eup %2456  ;;  %v3698_v16 = vadd.f32 %v723_v23, %v3413_v30 }
 0x156   :  { %5011 = vst [vmem:[#allocation34_spill] sm:$0xff] %v3690_v45  ;;  %v860_v28 = vsub.f32 1.5, %v859_v31  ;;  %v918_v40 = vmul.f32 %v2455_v26, %v917_v51  ;;  %v699_v37 = vsub.f32 %v640_v48, %v3557_v4  ;;  %v893_v45 = vmul.f32 %v2457_v11, %v3659_v27 }
 0x157   :  { %5012 = vst [vmem:[#allocation35_spill] sm:$0xff] %v3698_v16  ;;  %v980_v62 = vsub.f32 1.5, %v979_v22  ;;  %v694_v31 = vsub.f32 %v620_v0, %v3557_v4  ;;  %2460 = vrsqrt.f32 %v3698_v16  ;;  %v986_v46 = vand.u32 2147483648, %v3633_v24 }
 0x158   :  { %v861_v42 = vmul.f32 %v2451_v25, %v860_v28  ;;  %v919_v47 = vmul.f32 0.5, %v918_v40  ;;  %v894_v14 = vmul.f32 %v2457_v11, %v893_v45  ;;  %v2459_v48 = vpop.eup %2458  ;;  %v721_v51 = vmul.f32 %v689_v36, %v689_v36 }
 0x159   :  { %v981_v23 = vmul.f32 %v2453_v21, %v980_v62  ;;  %v731_v28 = vmul.f32 %v699_v37, %v699_v37  ;;  %v726_v22 = vmul.f32 %v694_v31, %v694_v31  ;;  %v1013_v7 = vmul.f32 %v2459_v48, %v3681_v58 }
 0x15a   :  { %v862_v30 = vmul.f32 %v861_v42, %v3630_v52  ;;  %v920_v25 = vsub.f32 1.5, %v919_v47  ;;  %v895_v40 = vmul.f32 0.5, %v894_v14  ;;  %v3719_v45 = vadd.f32 %v721_v51, %v3409_v10 }
 0x15b   :  { %v982_v12 = vmul.f32 %v981_v23, %v3633_v24  ;;  %v3722_v36 = vadd.f32 %v731_v28, %v3411_v54  ;;  %vm923_vm10 = vcmp.eq.f32.partialorder %v3650_v59, inf  ;;  %v1014_v47 = vmul.f32 %v2459_v48, %v1013_v7 }
 0x15c   :  { %v864_v0 = vsel %vm863_vm6, %v3630_v52, %v862_v30  ;;  %v921_v62 = vmul.f32 %v2455_v26, %v920_v25  ;;  %5014 = vst [vmem:[#allocation37_spill] sm:$0xff] %v3719_v45  ;;  %v896_v31 = vsub.f32 1.5, %v895_v40  ;;  %v652_v30 = vpop.permute.xlu2 %651  ;;  %2462 = vrsqrt.f32 %v3719_v45 }
 0x15d   :  { %v3716_v21 = vsel %vm865_vm7, %v866_v44, %v864_v0  ;;  %5015 = vst [vmem:[#allocation38_spill] sm:$0xff] %v3722_v36  ;;  %v3724_v37 = vpop.permute.xlu1 %623  ;;  %v984_v42 = vsel %vm983_vm8, %v3633_v24, %v982_v12  ;;  %v632_v44 = vpop.permute.xlu0 %631  ;;  %v3737_v26 = vadd.f32 %v726_v22, %v3431_v32  ;;  %v926_v12 = vand.u32 2147483648, %v3650_v59 }
 0x15e   :  { %5013 = vst [vmem:[#allocation36_spill] sm:$0xff] %v3716_v21  ;;  %v2461_v23 = vpop.eup %2460  ;;  %v3732_v10 = vsel %vm985_vm9, %v986_v46, %v984_v42  ;;  %v922_v54 = vmul.f32 %v921_v62, %v3650_v59  ;;  %v897_v14 = vmul.f32 %v2457_v11, %v896_v31  ;;  %v1015_v25 = vmul.f32 0.5, %v1014_v47 }
 0x15f   :  { %5016 = vst [vmem:[#allocation39_spill] sm:$0xff] %v3732_v10  ;;  %v953_v7 = vmul.f32 %v2461_v23, %v3698_v16  ;;  %vm925_vm11 = vcmp.eq.f32.partialorder %v3650_v59, 0.0  ;;  %vm899_vm12 = vcmp.eq.f32.partialorder %v3659_v27, inf  ;;  %2464 = vrsqrt.f32 %v3722_v36 }
 0x160   :  { %5017 = vst [vmem:[#allocation40_spill] sm:$0xff] %v3737_v26  ;;  %v924_v51 = vsel %vm923_vm10, %v3650_v59, %v922_v54  ;;  %v898_v28 = vmul.f32 %v897_v14, %v3659_v27  ;;  %v1016_v32 = vsub.f32 1.5, %v1015_v25  ;;  %vm901_vm13 = vcmp.eq.f32.partialorder %v3659_v27, 0.0 }
 0x161   :  { %v3745_v46 = vsel %vm925_vm11, %v926_v12, %v924_v51  ;;  %v954_v22 = vmul.f32 %v2461_v23, %v953_v7  ;;  %v902_v11 = vand.u32 2147483648, %v3659_v27  ;;  %vm1019_vm14 = vcmp.eq.f32.partialorder %v3681_v58, inf }
 0x162   :  { %5018 = vst [vmem:[#allocation41_spill] sm:$0xff] %v3745_v46  ;;  %2466 = vrsqrt.f32 %v3737_v26  ;;  %v900_v0 = vsel %vm899_vm12, %v3659_v27, %v898_v28  ;;  %v1017_v40 = vmul.f32 %v2459_v48, %v1016_v32  ;;  %vm1021_vm15 = vcmp.eq.f32.partialorder %v3681_v58, 0.0  ;;  %v2463_v42 = vpop.eup %2462 }
 0x163   :  { %v955_v62 = vmul.f32 0.5, %v954_v22  ;;  %v3754_v31 = vsel %vm901_vm13, %v902_v11, %v900_v0  ;;  %v1022_v47 = vand.u32 2147483648, %v3681_v58  ;;  %v692_v54 = vsub.f32 %v3683_v61, %v3557_v4 }
 0x164   :  { %5019 = vst [vmem:[#allocation42_spill] sm:$0xff] %v3754_v31  ;;  %v702_v12 = vsub.f32 %v652_v30, %v3557_v4  ;;  %v1018_v14 = vmul.f32 %v1017_v40, %v3681_v58  ;;  %vm959_vm0 = vcmp.eq.f32.partialorder %v3698_v16, inf  ;;  %v929_v48 = vmul.f32 %v2463_v42, %v3719_v45  ;;  %v664_v40 = vpop.permute.xlu2 %663 }
 0x165   :  { %v956_v25 = vsub.f32 1.5, %v955_v62  ;;  %v2465_v7 = vpop.eup %2464  ;;  %vm961_vm1 = vcmp.eq.f32.partialorder %v3698_v16, 0.0  ;;  %v724_v51 = vmul.f32 %v692_v54, %v692_v54  ;;  %v697_v32 = vsub.f32 %v632_v44, %v3557_v4  ;;  %v3765_v22 = vpop.permute.xlu1 %635 }
 0x166   :  { %v734_v28 = vmul.f32 %v702_v12, %v702_v12  ;;  %v1020_v61 = vsel %vm1019_vm14, %v3681_v58, %v1018_v14  ;;  %v930_v11 = vmul.f32 %v2463_v42, %v929_v48  ;;  %v1049_v0 = vmul.f32 %v2465_v7, %v3722_v36  ;;  %v644_v62 = vpop.permute.xlu0 %643 }
 0x167   :  { %v957_v30 = vmul.f32 %v2461_v23, %v956_v25  ;;  %v3773_v46 = vsel %vm1021_vm15, %v1022_v47, %v1020_v61  ;;  %v962_v54 = vand.u32 2147483648, %v3698_v16  ;;  %v3777_v44 = vadd.f32 %v724_v51, %v3427_v19 }
 0x168   :  { %v2467_v10 = vpop.eup %2466  ;;  %5020 = vst [vmem:[#allocation43_spill] sm:$0xff] %v3773_v46  ;;  %v3780_v12 = vadd.f32 %v734_v28, %v3429_v57  ;;  %v931_v14 = vmul.f32 0.5, %v930_v11  ;;  %v1050_v25 = vmul.f32 %v2465_v7, %v1049_v0  ;;  %v729_v31 = vmul.f32 %v697_v32, %v697_v32 }
 0x169   :  { %5021 = vst [vmem:[#allocation44_spill] sm:$0xff] %v3777_v44  ;;  %v958_v23 = vmul.f32 %v957_v30, %v3698_v16  ;;  %v989_v48 = vmul.f32 %v2467_v10, %v3737_v26  ;;  %2468 = vrsqrt.f32 %v3777_v44  ;;  %v695_v47 = vsub.f32 %v3724_v37, %v3557_v4 }
 0x16a   :  { %5022 = vst [vmem:[#allocation45_spill] sm:$0xff] %v3780_v12  ;;  %v705_v61 = vsub.f32 %v664_v40, %v3557_v4  ;;  %v932_v57 = vsub.f32 1.5, %v931_v14  ;;  %v1051_v51 = vmul.f32 0.5, %v1050_v25  ;;  %vm935_vm2 = vcmp.eq.f32.partialorder %v3719_v45, inf }
 0x16b   :  { %v960_v19 = vsel %vm959_vm0, %v3698_v16, %v958_v23  ;;  %v990_v28 = vmul.f32 %v2467_v10, %v989_v48  ;;  %vm937_vm3 = vcmp.eq.f32.partialorder %v3719_v45, 0.0  ;;  %2470 = vrsqrt.f32 %v3780_v12 }
 0x16c   :  { %v3793_v30 = vsel %vm961_vm1, %v962_v54, %v960_v19  ;;  %v933_v37 = vmul.f32 %v2463_v42, %v932_v57  ;;  %v938_v32 = vand.u32 2147483648, %v3719_v45  ;;  %v1052_v11 = vsub.f32 1.5, %v1051_v51 }
 0x16d   :  { %5023 = vst [vmem:[#allocation46_spill] sm:$0xff] %v3793_v30  ;;  %v991_v0 = vmul.f32 0.5, %v990_v28  ;;  %vm1055_vm4 = vcmp.eq.f32.partialorder %v3722_v36, inf  ;;  %v3801_v40 = vadd.f32 %v729_v31, %v3448_v3  ;;  %v727_v23 = vmul.f32 %v695_v47, %v695_v47  ;;  %v648_v51 = vpop.permute.xlu1 %647 }
 0x16e   :  { %v737_v14 = vmul.f32 %v705_v61, %v705_v61  ;;  %v934_v54 = vmul.f32 %v933_v37, %v3719_v45  ;;  %v1053_v25 = vmul.f32 %v2465_v7, %v1052_v11  ;;  %vm1057_vm5 = vcmp.eq.f32.partialorder %v3722_v36, 0.0  ;;  %v656_v61 = vpop.permute.xlu0 %655 }
 0x16f   :  { %5024 = vst [vmem:[#allocation47_spill] sm:$0xff] %v3801_v40  ;;  %v992_v48 = vsub.f32 1.5, %v991_v0  ;;  %v2469_v19 = vpop.eup %2468  ;;  %v1058_v42 = vand.u32 2147483648, %v3722_v36  ;;  %vm995_vm6 = vcmp.eq.f32.partialorder %v3737_v26, inf  ;;  %2472 = vrsqrt.f32 %v3801_v40 }
 0x170   :  { %v700_v57 = vsub.f32 %v644_v62, %v3557_v4  ;;  %v936_v3 = vsel %vm935_vm2, %v3719_v45, %v934_v54  ;;  %v1054_v31 = vmul.f32 %v1053_v25, %v3722_v36  ;;  %v965_v47 = vmul.f32 %v2469_v19, %v3777_v44 }
 0x171   :  { %v993_v7 = vmul.f32 %v2467_v10, %v992_v48  ;;  %v2471_v28 = vpop.eup %2470  ;;  %v3816_v37 = vsel %vm937_vm3, %v938_v32, %v936_v3  ;;  %v998_v11 = vand.u32 2147483648, %v3737_v26  ;;  %v3820_v62 = vadd.f32 %v727_v23, %v3444_v60 }
 0x172   :  { %5025 = vst [vmem:[#allocation48_spill] sm:$0xff] %v3816_v37  ;;  %v3823_v0 = vadd.f32 %v737_v14, %v3446_v15  ;;  %v1056_v10 = vsel %vm1055_vm4, %v3722_v36, %v1054_v31  ;;  %v966_v25 = vmul.f32 %v2469_v19, %v965_v47  ;;  %v1085_v48 = vmul.f32 %v2471_v28, %v3780_v12 }
 0x173   :  { %5026 = vst [vmem:[#allocation49_spill] sm:$0xff] %v3820_v62  ;;  %v994_v54 = vmul.f32 %v993_v7, %v3737_v26  ;;  %v3832_v32 = vsel %vm1057_vm5, %v1058_v42, %v1056_v10  ;;  %2474 = vrsqrt.f32 %v3820_v62  ;;  %v732_v60 = vmul.f32 %v700_v57, %v700_v57 }
 0x174   :  { %5027 = vst [vmem:[#allocation50_spill] sm:$0xff] %v3823_v0  ;;  %v698_v15 = vsub.f32 %v3765_v22, %v3557_v4  ;;  %vm997_vm7 = vcmp.eq.f32.partialorder %v3737_v26, 0.0  ;;  %v967_v14 = vmul.f32 0.5, %v966_v25  ;;  %v1086_v3 = vmul.f32 %v2471_v28, %v1085_v48 }
 0x175   :  { %5028 = vst [vmem:[#allocation51_spill] sm:$0xff] %v3832_v32  ;;  %v996_v23 = vsel %vm995_vm6, %v3737_v26, %v994_v54  ;;  %v2473_v31 = vpop.eup %2472  ;;  %2476 = vrsqrt.f32 %v3823_v0  ;;  %vm971_vm8 = vcmp.eq.f32.partialorder %v3777_v44, inf  ;;  %v3847_v22 = vadd.f32 %v732_v60, %v3463_v13  ;;  %v660_v13 = vpop.permute.xlu1 %659 }
 0x176   :  { %v3841_v7 = vsel %vm997_vm7, %v998_v11, %v996_v23  ;;  %v968_v42 = vsub.f32 1.5, %v967_v14  ;;  %v1087_v57 = vmul.f32 0.5, %v1086_v3  ;;  %v1025_v47 = vmul.f32 %v2473_v31, %v3801_v40 }
 0x177   :  { %5029 = vst [vmem:[#allocation52_spill] sm:$0xff] %v3841_v7  ;;  %v730_v10 = vmul.f32 %v698_v15, %v698_v15  ;;  %v703_v54 = vsub.f32 %v656_v61, %v3557_v4  ;;  %v701_v25 = vsub.f32 %v648_v51, %v3557_v4  ;;  %vm973_vm9 = vcmp.eq.f32.partialorder %v3777_v44, 0.0  ;;  %v668_v51 = vpop.permute.xlu0 %667 }
 0x178   :  { %5030 = vst [vmem:[#allocation53_spill] sm:$0xff] %v3847_v22  ;;  %v969_v48 = vmul.f32 %v2469_v19, %v968_v42  ;;  %v1088_v11 = vsub.f32 1.5, %v1087_v57  ;;  %v1026_v23 = vmul.f32 %v2473_v31, %v1025_v47  ;;  %v974_v14 = vand.u32 2147483648, %v3777_v44 }
 0x179   :  { %v2475_v32 = vpop.eup %2474  ;;  %vm1091_vm10 = vcmp.eq.f32.partialorder %v3780_v12, inf  ;;  %vm1093_vm11 = vcmp.eq.f32.partialorder %v3780_v12, 0.0  ;;  %2478 = vrsqrt.f32 %v3847_v22  ;;  %v1094_v42 = vand.u32 2147483648, %v3780_v12 }
 0x17a   :  { %v970_v60 = vmul.f32 %v969_v48, %v3777_v44  ;;  %v1089_v61 = vmul.f32 %v2471_v28, %v1088_v11  ;;  %v1027_v15 = vmul.f32 0.5, %v1026_v23  ;;  %v1001_v19 = vmul.f32 %v2475_v32, %v3820_v62 }
 0x17b   :  { %v2477_v3 = vpop.eup %2476  ;;  %v3860_v57 = vadd.f32 %v730_v10, %v3461_v63  ;;  %v735_v47 = vmul.f32 %v703_v54, %v703_v54  ;;  %v733_v46 = vmul.f32 %v701_v25, %v701_v25  ;;  %v706_v63 = vsub.f32 %v668_v51, %v3557_v4 }
 0x17c   :  { %v972_v7 = vsel %vm971_vm8, %v3777_v44, %v970_v60  ;;  %v1090_v30 = vmul.f32 %v1089_v61, %v3780_v12  ;;  %v1028_v48 = vsub.f32 1.5, %v1027_v15  ;;  %v1002_v28 = vmul.f32 %v2475_v32, %v1001_v19 }
 0x17d   :  { %5031 = vst [vmem:[#allocation54_spill] sm:$0xff] %v3860_v57  ;;  %v3868_v11 = vsel %vm973_vm9, %v974_v14, %v972_v7  ;;  %v1121_v23 = vmul.f32 %v2477_v3, %v3823_v0  ;;  %2480 = vrsqrt.f32 %v3860_v57  ;;  %vm1031_vm12 = vcmp.eq.f32.partialorder %v3801_v40, inf }
 0x17e   :  { %5032 = vst [vmem:[#allocation55_spill] sm:$0xff] %v3868_v11  ;;  %v1092_v10 = vsel %vm1091_vm10, %v3780_v12, %v1090_v30  ;;  %v1029_v54 = vmul.f32 %v2473_v31, %v1028_v48  ;;  %v1003_v25 = vmul.f32 0.5, %v1002_v28  ;;  %vm1033_vm13 = vcmp.eq.f32.partialorder %v3801_v40, 0.0 }
 0x17f   :  { %v2479_v60 = vpop.eup %2478  ;;  %v3879_v61 = vsel %vm1093_vm11, %v1094_v42, %v1092_v10  ;;  %v1122_v7 = vmul.f32 %v2477_v3, %v1121_v23  ;;  %v3883_v14 = vadd.f32 %v735_v47, %v3478_v5  ;;  %v3888_v31 = vadd.f32 %v733_v46, %v3476_v39  ;;  %v672_v46 = vpop.permute.xlu1 %671 }
 0x180   :  { %5033 = vst [vmem:[#allocation56_spill] sm:$0xff] %v3879_v61  ;;  %v1030_v15 = vmul.f32 %v1029_v54, %v3801_v40  ;;  %v1004_v19 = vsub.f32 1.5, %v1003_v25  ;;  %v1061_v30 = vmul.f32 %v2479_v60, %v3847_v22  ;;  %v1034_v51 = vand.u32 2147483648, %v3801_v40 }
 0x181   :  { %5034 = vst [vmem:[#allocation57_spill] sm:$0xff] %v3883_v14  ;;  %v1123_v48 = vmul.f32 0.5, %v1122_v7  ;;  %2482 = vrsqrt.f32 %v3883_v14  ;;  %v738_v42 = vmul.f32 %v706_v63, %v706_v63  ;;  %vm1007_vm14 = vcmp.eq.f32.partialorder %v3820_v62, inf }
 0x182   :  { %5035 = vst [vmem:[#allocation58_spill] sm:$0xff] %v3888_v31  ;;  %v1032_v28 = vsel %vm1031_vm12, %v3801_v40, %v1030_v15  ;;  %v1005_v23 = vmul.f32 %v2475_v32, %v1004_v19  ;;  %v1062_v5 = vmul.f32 %v2479_v60, %v1061_v30  ;;  %vm1009_vm15 = vcmp.eq.f32.partialorder %v3820_v62, 0.0 }
 0x183   :  { %v2481_v47 = vpop.eup %2480  ;;  %v3896_v10 = vsel %vm1033_vm13, %v1034_v51, %v1032_v28  ;;  %v1124_v39 = vsub.f32 1.5, %v1123_v48  ;;  %2484 = vrsqrt.f32 %v3888_v31  ;;  %v1010_v63 = vand.u32 2147483648, %v3820_v62 }
 0x184   :  { %5036 = vst [vmem:[#allocation59_spill] sm:$0xff] %v3896_v10  ;;  %v1006_v54 = vmul.f32 %v1005_v23, %v3820_v62  ;;  %v1063_v25 = vmul.f32 0.5, %v1062_v5  ;;  %v1037_v32 = vmul.f32 %v2481_v47, %v3860_v57  ;;  %vm1127_vm0 = vcmp.eq.f32.partialorder %v3823_v0, inf }
 0x185   :  { %v1125_v7 = vmul.f32 %v2477_v3, %v1124_v39  ;;  %v3905_v15 = vadd.f32 %v738_v42, %v3496_v50  ;;  %v704_v19 = vsub.f32 %v660_v13, %v3557_v4  ;;  %v707_v28 = vsub.f32 %v672_v46, %v3557_v4 }
 0x186   :  { %v1008_v30 = vsel %vm1007_vm14, %v3820_v62, %v1006_v54  ;;  %v1064_v51 = vsub.f32 1.5, %v1063_v25  ;;  %v1038_v48 = vmul.f32 %v2481_v47, %v1037_v32  ;;  %vm1129_vm1 = vcmp.eq.f32.partialorder %v3823_v0, 0.0 }
 0x187   :  { %5037 = vst [vmem:[#allocation60_spill] sm:$0xff] %v3905_v15  ;;  %v2483_v23 = vpop.eup %2482  ;;  %v3914_v5 = vsel %vm1009_vm15, %v1010_v63, %v1008_v30  ;;  %v1126_v3 = vmul.f32 %v1125_v7, %v3823_v0  ;;  %2486 = vrsqrt.f32 %v3905_v15  ;;  %v1130_v50 = vand.u32 2147483648, %v3823_v0 }
 0x188   :  { %5038 = vst [vmem:[#allocation61_spill] sm:$0xff] %v3914_v5  ;;  %v1065_v13 = vmul.f32 %v2479_v60, %v1064_v51  ;;  %v1039_v42 = vmul.f32 0.5, %v1038_v48  ;;  %v1097_v39 = vmul.f32 %v2483_v23, %v3883_v14  ;;  %vm1067_vm2 = vcmp.eq.f32.partialorder %v3847_v22, inf }
 0x189   :  { %v2485_v54 = vpop.eup %2484  ;;  %v1128_v4 = vsel %vm1127_vm0, %v3823_v0, %v1126_v3  ;;  %v736_v46 = vmul.f32 %v704_v19, %v704_v19  ;;  %v739_v63 = vmul.f32 %v707_v28, %v707_v28  ;;  %v1070_v60 = vand.u32 2147483648, %v3847_v22 }
 0x18a   :  { %v3925_v25 = vsel %vm1129_vm1, %v1130_v50, %v1128_v4  ;;  %v1066_v32 = vmul.f32 %v1065_v13, %v3847_v22  ;;  %v1040_v7 = vsub.f32 1.5, %v1039_v42  ;;  %v1098_v30 = vmul.f32 %v2483_v23, %v1097_v39 }
 0x18b   :  { %5039 = vst [vmem:[#allocation62_spill] sm:$0xff] %v3925_v25  ;;  %v1073_v51 = vmul.f32 %v2485_v54, %v3888_v31  ;;  %v3931_v48 = vadd.f32 %v736_v46, %v3494_v49  ;;  %v3934_v61 = vadd.f32 %v739_v63, %v3513_v9  ;;  %vm1069_vm3 = vcmp.eq.f32.partialorder %v3847_v22, 0.0 }
 0x18c   :  { %v1068_v3 = vsel %vm1067_vm2, %v3847_v22, %v1066_v32  ;;  %v1041_v19 = vmul.f32 %v2481_v47, %v1040_v7  ;;  %v1099_v28 = vmul.f32 0.5, %v1098_v30  ;;  %vm1043_vm4 = vcmp.eq.f32.partialorder %v3860_v57, inf }
 0x18d   :  { %5040 = vst [vmem:[#allocation63_spill] sm:$0xff] %v3931_v48  ;;  %v2487_v50 = vpop.eup %2486  ;;  %v3938_v13 = vsel %vm1069_vm3, %v1070_v60, %v1068_v3  ;;  %v1074_v42 = vmul.f32 %v2485_v54, %v1073_v51  ;;  %2488 = vrsqrt.f32 %v3931_v48  ;;  %v1046_v9 = vand.u32 2147483648, %v3860_v57 }
 0x18e   :  { %5041 = vst [vmem:[#allocation64_spill] sm:$0xff] %v3934_v61  ;;  %v1042_v39 = vmul.f32 %v1041_v19, %v3860_v57  ;;  %v1100_v4 = vsub.f32 1.5, %v1099_v28  ;;  %v1133_v49 = vmul.f32 %v2487_v50, %v3905_v15  ;;  %2490 = vrsqrt.f32 %v3934_v61 }
 0x18f   :  { %5042 = vst [vmem:[#allocation65_spill] sm:$0xff] %v3938_v13  ;;  %v1075_v46 = vmul.f32 0.5, %v1074_v42  ;;  %vm1045_vm5 = vcmp.eq.f32.partialorder %v3860_v57, 0.0  ;;  %vm1103_vm6 = vcmp.eq.f32.partialorder %v3883_v14, inf  ;;  %v1106_v19 = vand.u32 2147483648, %v3883_v14 }
 0x190   :  { %v1044_v47 = vsel %vm1043_vm4, %v3860_v57, %v1042_v39  ;;  %v1101_v63 = vmul.f32 %v2483_v23, %v1100_v4  ;;  %v1134_v32 = vmul.f32 %v2487_v50, %v1133_v49  ;;  %vm1105_vm7 = vcmp.eq.f32.partialorder %v3883_v14, 0.0 }
 0x191   :  { %v3948_v7 = vsel %vm1045_vm5, %v1046_v9, %v1044_v47  ;;  %v1076_v30 = vsub.f32 1.5, %v1075_v46  ;;  %vm1079_vm8 = vcmp.eq.f32.partialorder %v3888_v31, inf  ;;  %v1082_v46 = vand.u32 2147483648, %v3888_v31 }
 0x192   :  { %5043 = vst [vmem:[#allocation66_spill] sm:$0xff] %v3948_v7  ;;  %v1102_v60 = vmul.f32 %v1101_v63, %v3883_v14  ;;  %v1135_v51 = vmul.f32 0.5, %v1134_v32  ;;  %vm1081_vm9 = vcmp.eq.f32.partialorder %v3888_v31, 0.0  ;;  %vm1139_vm10 = vcmp.eq.f32.partialorder %v3905_v15, inf }
 0x193   :  { %v2489_v3 = vpop.eup %2488  ;;  %v1077_v28 = vmul.f32 %v2485_v54, %v1076_v30  ;;  %vm1141_vm11 = vcmp.eq.f32.partialorder %v3905_v15, 0.0  ;;  %vm1115_vm12 = vcmp.eq.f32.partialorder %v3931_v48, inf  ;;  %vm1117_vm13 = vcmp.eq.f32.partialorder %v3931_v48, 0.0 }
 0x194   :  { %v1104_v42 = vsel %vm1103_vm6, %v3883_v14, %v1102_v60  ;;  %v1136_v39 = vsub.f32 1.5, %v1135_v51  ;;  %v1109_v23 = vmul.f32 %v2489_v3, %v3931_v48  ;;  %v2491_v4 = vpop.eup %2490  ;;  %vm1151_vm14 = vcmp.eq.f32.partialorder %v3934_v61, inf }
 0x195   :  { %v3956_v49 = vsel %vm1105_vm7, %v1106_v19, %v1104_v42  ;;  %v1078_v9 = vmul.f32 %v1077_v28, %v3888_v31  ;;  %v1145_v54 = vmul.f32 %v2491_v4, %v3934_v61  ;;  %v1142_v28 = vand.u32 2147483648, %v3905_v15 }
 0x196   :  { %5044 = vst [vmem:[#allocation67_spill] sm:$0xff] %v3956_v49  ;;  %v1137_v47 = vmul.f32 %v2487_v50, %v1136_v39  ;;  %v1110_v63 = vmul.f32 %v2489_v3, %v1109_v23  ;;  %vm1153_vm15 = vcmp.eq.f32.partialorder %v3934_v61, 0.0  ;;  %v4019_v49 = vmov 1.0  }
 0x197   :  { %v1080_v32 = vsel %vm1079_vm8, %v3888_v31, %v1078_v9  ;;  %v1146_v19 = vmul.f32 %v2491_v4, %v1145_v54  ;;  %v4023_v13 = vmov 1.0   ;;  %v4027_v10 = vmov 1.0  }
 0x198   :  { %v3964_v30 = vsel %vm1081_vm9, %v1082_v46, %v1080_v32  ;;  %v1138_v60 = vmul.f32 %v1137_v47, %v3905_v15  ;;  %v1111_v51 = vmul.f32 0.5, %v1110_v63  ;;  %v1118_v47 = vand.u32 2147483648, %v3931_v48 }
 0x199   :  { %5045 = vst [vmem:[#allocation68_spill] sm:$0xff] %v3964_v30  ;;  %v1147_v39 = vmul.f32 0.5, %v1146_v19  ;;  %v3989_v19 = vmov 1.0   ;;  %v4025_v30 = vmov 1.0   ;;  %v4029_v7 = vmov 1.0  }
 0x19a   :  { %v1140_v42 = vsel %vm1139_vm10, %v3905_v15, %v1138_v60  ;;  %v1112_v50 = vsub.f32 1.5, %v1111_v51  ;;  %v4031_v5 = vmov 1.0   ;;  %v4033_v11 = vmov 1.0  }
 0x19b   :  { %v3971_v23 = vsel %vm1141_vm11, %v1142_v28, %v1140_v42  ;;  %v1148_v25 = vsub.f32 1.5, %v1147_v39  ;;  %v3991_v28 = vmov 1.0   ;;  %v3993_v42 = vmov 1.0  }
 0x19c   :  { %5046 = vst [vmem:[#allocation69_spill] sm:$0xff] %v3971_v23  ;;  %v1113_v9 = vmul.f32 %v2489_v3, %v1112_v50  ;;  %v1154_v3 = vand.u32 2147483648, %v3934_v61  ;;  %v3995_v50 = vmov 1.0   ;;  %v3997_v39 = vmov 1.0  }
 0x19d   :  { %v1149_v32 = vmul.f32 %v2491_v4, %v1148_v25  ;;  %v3987_v4 = vmov 1.0   ;;  %v4015_v23 = vmov 1.0   ;;  %v4035_v37 = vmov 1.0  }
 0x19e   :  { %v1114_v46 = vmul.f32 %v1113_v9, %v3931_v48  ;;  %v3999_v9 = vmov 1.0   ;;  %v4037_v17 = vmov 1.0   ;;  %v4041_v21 = vmov 1.0  }
 0x19f   :  { %v1150_v54 = vmul.f32 %v1149_v32, %v3934_v61  ;;  %v4003_v32 = vmov 1.0   ;;  %v4043_v6 = vmov 1.0   ;;  %v4047_v35 = vmov 1.0  }
 0x1a0   :  { %v1116_v63 = vsel %vm1115_vm12, %v3931_v48, %v1114_v46  ;;  %v4001_v46 = vmov 1.0   ;;  %v4049_v55 = vmov 1.0   ;;  %v4051_v15 = vmov 1.0  }
 0x1a1   :  { %v3979_v60 = vsel %vm1117_vm13, %v1118_v47, %v1116_v63  ;;  %v1152_v51 = vsel %vm1151_vm14, %v3934_v61, %v1150_v54  ;;  %v4005_v47 = vmov 1.0   ;;  %v4007_v63 = vmov 1.0  }
 0x1a2   :  { %5047 = vst [vmem:[#allocation70_spill] sm:$0xff] %v3979_v60  ;;  %v3985_v25 = vsel %vm1153_vm15, %v1154_v3, %v1152_v51  ;;  %v4009_v54 = vmov 1.0   ;;  %v4011_v3 = vmov 1.0   ;;  %v4013_v51 = vmov 1.0  }
 0x1a3   :  { %5048 = vst [vmem:[#allocation71_spill] sm:$0xff] %v3985_v25  ;;  %v4017_v25 = vmov 1.0   ;;  %v4021_v60 = vmov 1.0   ;;  %v4053_v61 = vmov 1.0   ;;  %v4055_v14 = vmov 0.0  }
 0x1a4   :  { %v4057_v48 = vmov 0.0  }
 0x1a5 LB: > { %5049 = vst [vmem:[#allocation72_spill] sm:$0xff] %v2814_v4  ;;  %s1198_s26 = sld [smem:[#allocation2 + %s2958_s2]]  ;;  %v5075_v43 = vld [vmem:[#allocation19_spill] sm:$0xff]  ;;  %v5078_v38 = vld [vmem:[#allocation8_spill] sm:$0xff]  ;;  %v5079_v34 = vld [vmem:[#allocation9_spill] sm:$0xff]  ;;  %s1161_s27 = sadd.s32 1, %s2958_s2   ;;  %s2958_s2 = sphi %s4059_s2, %s5217_s2   ;;  %v2954_v48 = vphi %v4057_v48, %v5216_v48   ;;  %v2950_v14 = vphi %v4055_v14, %v5215_v14   ;;  %v2946_v61 = vphi %v4053_v61, %v4691_v61   ;;  %v2942_v15 = vphi %v4051_v15, %v4685_v15   ;;  %v2938_v55 = vphi %v4049_v55, %v4683_v55   ;;  %v2934_v35 = vphi %v4047_v35, %v4706_v35   ;;  %v2930_v20 = vphi %v4045_v20, %v5214_v20   ;;  %v2926_v6 = vphi %v4043_v6, %v4698_v6   ;;  %v2922_v21 = vphi %v4041_v21, %v4719_v21   ;;  %v2918_v56 = vphi %v4039_v56, %v4715_v56   ;;  %v2914_v17 = vphi %v4037_v17, %v4713_v17   ;;  %v2910_v37 = vphi %v4035_v37, %v4729_v37   ;;  %v2906_v11 = vphi %v4033_v11, %v4727_v11   ;;  %v2902_v5 = vphi %v4031_v5, %v4725_v5   ;;  %v2898_v7 = vphi %v4029_v7, %v4741_v7   ;;  %v2894_v10 = vphi %v4027_v10, %v4739_v10   ;;  %v2890_v30 = vphi %v4025_v30, %v4737_v30   ;;  %v2886_v13 = vphi %v4023_v13, %v4753_v13   ;;  %v2882_v60 = vphi %v4021_v60, %v4751_v60   ;;  %v2878_v49 = vphi %v4019_v49, %v4749_v49   ;;  %v2874_v25 = vphi %v4017_v25, %v4762_v25   ;;  %v2870_v23 = vphi %v4015_v23, %v5213_v23   ;;  %v2866_v51 = vphi %v4013_v51, %v1960_v51   ;;  %v2862_v3 = vphi %v4011_v3, %v1961_v3   ;;  %v2858_v54 = vphi %v4009_v54, %v1962_v54   ;;  %v2854_v63 = vphi %v4007_v63, %v1963_v63   ;;  %v2850_v47 = vphi %v4005_v47, %v1964_v47   ;;  %v2846_v32 = vphi %v4003_v32, %v1965_v32   ;;  %v2842_v46 = vphi %v4001_v46, %v5212_v46   ;;  %v2838_v9 = vphi %v3999_v9, %v1967_v9   ;;  %v2834_v39 = vphi %v3997_v39, %v1968_v39   ;;  %v2830_v50 = vphi %v3995_v50, %v1969_v50   ;;  %v2826_v42 = vphi %v3993_v42, %v1970_v42   ;;  %v2822_v28 = vphi %v3991_v28, %v1971_v28   ;;  %v2818_v19 = vphi %v3989_v19, %v5211_v19   ;;  %v2814_v4 = vphi %v3987_v4, %v5210_v4  }
 0x1a6   : > { %5050 = vst [vmem:[#allocation73_spill] sm:$0xff] %v2818_v19  ;;  %v5076_v18 = vld [vmem:[#allocation15_spill] sm:$0xff]  ;;  %v5080_v1 = vld [vmem:[#allocation13_spill] sm:$0xff]  ;;  %v5081_v29 = vld [vmem:[#allocation10_spill] sm:$0xff]  ;;  %p4784_p0 = scmp.ge.s32.totalorder %s1161_s27, 10   ;;  %s5217_s2 = smov %s1161_s27 }
 0x1a7   : > { %5051 = vst [vmem:[#allocation74_spill] sm:$0xff] %v2822_v28  ;;  %v5077_v2 = vld [vmem:[#allocation11_spill] sm:$0xff]  ;;  %v5082_v52 = vld [vmem:[#allocation26_spill] sm:$0xff]  ;;  %v5083_v53 = vld [vmem:[#allocation17_spill] sm:$0xff]  ;;  %s1988_s4 = sshll.u32 (%p4784_p0), %s4896_s3, 4  ;;  %s2964_s5 = smov (%p4784_p0), [#allocation5]   ;;  %s1989_s4 = int_to_ptr.hbm [resolvable:$true] %s1988_s4 }
 0x1a8   : > { %5052 = vst [vmem:[#allocation75_spill] sm:$0xff] %v2826_v42  ;;  %v5084_v8 = vld [vmem:[#allocation16_spill] sm:$0xff]  ;;  %v5085_v27 = vld [vmem:[#allocation30_spill] sm:$0xff]  ;;  %v5086_v41 = vld [vmem:[#allocation21_spill] sm:$0xff]  ;;  %s1986_s6 = sshll.u32 (%p4784_p0), %s2964_s5, 4  ;;  %s2965_s7 = smov (%p4784_p0), 128   ;;  %s1987_s6 = int_to_ptr.vmem [resolvable:$true] %s1986_s6 }
 0x1a9   : > { %5053 = vst [vmem:[#allocation76_spill] sm:$0xff] %v2830_v50  ;;  %v5087_v33 = vld [vmem:[#allocation20_spill] sm:$0xff]  ;;  %v5088_v45 = vld [vmem:[#allocation37_spill] sm:$0xff]  ;;  %v5090_v24 = vld [vmem:[#allocation27_spill] sm:$0xff]  ;;  %s2966_s8 = smov (%p4784_p0), 8  }
 0x1aa   : > { %5054 = vst [vmem:[#allocation77_spill] sm:$0xff] %v2834_v39  ;;  %v5089_v59 = vld [vmem:[#allocation29_spill] sm:$0xff]  ;;  %v5091_v44 = vld [vmem:[#allocation44_spill] sm:$0xff]  ;;  %v5092_v16 = vld [vmem:[#allocation35_spill] sm:$0xff] }
 0x1ab   : > { %5055 = vst [vmem:[#allocation78_spill] sm:$0xff] %v2838_v9  ;;  %v4173_v28 = vstv %s1198_s26  ;;  %v5093_v58 = vld [vmem:[#allocation32_spill] sm:$0xff]  ;;  %v5095_v62 = vld [vmem:[#allocation49_spill] sm:$0xff]  ;;  %v5097_v36 = vld [vmem:[#allocation38_spill] sm:$0xff] }
 0x1ac   : > { %5056 = vst [vmem:[#allocation79_spill] sm:$0xff] %v2842_v46  ;;  %v1204_v42 = vmul.f32 %v4173_v28, %v5075_v43  ;;  %v1202_v50 = vmul.f32 %v4173_v28, %v5076_v18  ;;  %v1200_v39 = vmul.f32 %v4173_v28, %v5077_v2  ;;  %v1208_v2 = vmul.f32 %v4173_v28, %v5081_v29  ;;  %v5096_v26 = vld [vmem:[#allocation40_spill] sm:$0xff]  ;;  %v5098_v57 = vld [vmem:[#allocation54_spill] sm:$0xff]  ;;  %v5099_v40 = vld [vmem:[#allocation47_spill] sm:$0xff] }
 0x1ad   : > { %5057 = vst [vmem:[#allocation80_spill] sm:$0xff] %v2846_v32  ;;  %v5101_v12 = vld [vmem:[#allocation45_spill] sm:$0xff]  ;;  %v5103_v31 = vld [vmem:[#allocation58_spill] sm:$0xff] }
 0x1ae   : > { %5058 = vst [vmem:[#allocation81_spill] sm:$0xff] %v2850_v47  ;;  %v1240_v9 = vmul.f32 1.442695, %v1204_v42  ;;  %v1236_v46 = vmul.f32 1.442695, %v1202_v50  ;;  %v1201_v47 = vmul.f32 %v4173_v28, %v5080_v1  ;;  %v1206_v50 = vmul.f32 %v4173_v28, %v5083_v53  ;;  %v5105_v22 = vld [vmem:[#allocation53_spill] sm:$0xff] }
 0x1af   : > { %5059 = vst [vmem:[#allocation82_spill] sm:$0xff] %v2854_v63  ;;  %v1232_v32 = vmul.f32 1.442695, %v1200_v39  ;;  %v5107_v0 = vld [vmem:[#allocation50_spill] sm:$0xff] }
 0x1b0   : > { %5060 = vst [vmem:[#allocation83_spill] sm:$0xff] %v2858_v54  ;;  %2492 = vpow2.f32 %v1240_v9  ;;  %v1234_v18 = vmul.f32 1.442695, %v1201_v47 }
 0x1b1   : > { %5061 = vst [vmem:[#allocation84_spill] sm:$0xff] %v2862_v3  ;;  %2494 = vpow2.f32 %v1236_v46 }
 0x1b2   : > { %5062 = vst [vmem:[#allocation85_spill] sm:$0xff] %v2866_v51  ;;  %2496 = vpow2.f32 %v1232_v32 }
 0x1b3   : > { %5063 = vst [vmem:[#allocation86_spill] sm:$0xff] %v2870_v23 }
 0x1b4   : > { %5064 = vst [vmem:[#allocation87_spill] sm:$0xff] %v2874_v25 }
 0x1b5   : > { %5065 = vst [vmem:[#allocation88_spill] sm:$0xff] %v2878_v49 }
 0x1b6   : > { %5066 = vst [vmem:[#allocation89_spill] sm:$0xff] %v2882_v60  ;;  %v2493_v42 = vpop.eup %2492 }
 0x1b7   : > { %5067 = vst [vmem:[#allocation90_spill] sm:$0xff] %v2886_v13  ;;  %v2495_v39 = vpop.eup %2494 }
 0x1b8   : > { %5068 = vst [vmem:[#allocation91_spill] sm:$0xff] %v2930_v20  ;;  %v4197_v9 = vmul.f32 %v2818_v19, %v2495_v39  ;;  %v1211_v39 = vmul.f32 %v4173_v28, %v5084_v8 }
 0x1b9   : > { %5069 = vst [vmem:[#allocation92_spill] sm:$0xff] %v2934_v35 }
 0x1ba   : > { %5070 = vst [vmem:[#allocation93_spill] sm:$0xff] %v2938_v55  ;;  %1332 = vadd.xlane.f32.xlu1 %v4197_v9 }
 0x1bb   : > { %5071 = vst [vmem:[#allocation94_spill] sm:$0xff] %v2942_v15 }
 0x1bc   : > { %5072 = vst [vmem:[#allocation95_spill] sm:$0xff] %v2946_v61 }
 0x1bd   : > { %5073 = vst [vmem:[#allocation96_spill] sm:$0xff] %v2950_v14  ;;  %v1205_v14 = vmul.f32 %v4173_v28, %v5078_v38 }
 0x1be   : > { %5074 = vst [vmem:[#allocation97_spill] sm:$0xff] %v2954_v48  ;;  %v1203_v48 = vmul.f32 %v4173_v28, %v5079_v34  ;;  %v1207_v34 = vmul.f32 %v4173_v28, %v5082_v52 }
 0x1bf   : > { %v1242_v43 = vmul.f32 1.442695, %v1205_v14  ;;  %v4194_v14 = vmul.f32 %v2818_v19, %v2493_v42 }
 0x1c0   : > { %v1238_v63 = vmul.f32 1.442695, %v1203_v48  ;;  %v2497_v48 = vpop.eup %2496  ;;  %v1246_v32 = vmul.f32 1.442695, %v1207_v34 }
 0x1c1   : > { %2498 = vpow2.f32 %v1242_v43  ;;  %v1248_v43 = vmul.f32 1.442695, %v1208_v2  ;;  %1336 = vadd.xlane.f32.xlu2 %v4194_v14  ;;  %v4201_v46 = vmul.f32 %v2818_v19, %v2497_v48  ;;  %v1210_v48 = vmul.f32 %v4173_v28, %v5085_v27 }
 0x1c2   : > { %2500 = vpow2.f32 %v1238_v63 }
 0x1c3   : > { %2502 = vpow2.f32 %v1234_v18  ;;  %v1244_v18 = vmul.f32 1.442695, %v1206_v50  ;;  %1328 = vadd.xlane.f32.xlu0 %v4201_v46  ;;  %v1209_v50 = vmul.f32 %v4173_v28, %v5086_v41  ;;  %v1252_v8 = vmul.f32 1.442695, %v1210_v48 }
 0x1c4   : > { %2504 = vpow2.f32 %v1248_v43  ;;  %v1254_v43 = vmul.f32 1.442695, %v1211_v39  ;;  %v1212_v48 = vmul.f32 %v4173_v28, %v5089_v59 }
 0x1c5   : > { %2506 = vpow2.f32 %v1246_v32  ;;  %v1250_v32 = vmul.f32 1.442695, %v1209_v50 }
 0x1c6   : > { %2508 = vpow2.f32 %v1244_v18  ;;  %v1214_v18 = vmul.f32 %v4173_v28, %v5087_v33 }
 0x1c7   : > { %v2499_v47 = vpop.eup %2498  ;;  %2510 = vpow2.f32 %v1254_v43 }
 0x1c8   : > { %v2501_v63 = vpop.eup %2500  ;;  %v4208_v2 = vmul.f32 %v2818_v19, %v2499_v47  ;;  %2512 = vpow2.f32 %v1252_v8  ;;  %v1260_v43 = vmul.f32 1.442695, %v1214_v18  ;;  %v1256_v8 = vmul.f32 1.442695, %v1212_v48 }
 0x1c9   : > { %v2503_v42 = vpop.eup %2502  ;;  %v4213_v34 = vmul.f32 %v2818_v19, %v2501_v63  ;;  %2514 = vpow2.f32 %v1250_v32  ;;  %v1217_v32 = vmul.f32 %v4173_v28, %v5090_v24 }
 0x1ca   : > { %v4218_v1 = vmul.f32 %v2818_v19, %v2503_v42  ;;  %1338 = vadd.xlane.f32.xlu2 %v4208_v2  ;;  %v2505_v47 = vpop.eup %2504  ;;  %v1213_v42 = vmul.f32 %v4173_v28, %v5088_v45  ;;  %2516 = vpow2.f32 %v1260_v43 }
 0x1cb   : > { %1334 = vadd.xlane.f32.xlu1 %v4213_v34  ;;  %v2507_v29 = vpop.eup %2506  ;;  %v4226_v27 = vmul.f32 %v2818_v19, %v2505_v47  ;;  %v1266_v43 = vmul.f32 1.442695, %v1217_v32 }
 0x1cc   : > { %1330 = vadd.xlane.f32.xlu0 %v4218_v1  ;;  %v2509_v63 = vpop.eup %2508  ;;  %v4231_v39 = vmul.f32 %v2818_v19, %v2507_v29  ;;  %v1258_v33 = vmul.f32 1.442695, %v1213_v42  ;;  %v1215_v42 = vmul.f32 %v4173_v28, %v5092_v16 }
 0x1cd   : > { %v4236_v50 = vmul.f32 %v2818_v19, %v2509_v63  ;;  %v2511_v47 = vpop.eup %2510  ;;  %v1216_v63 = vmul.f32 %v4173_v28, %v5091_v44 }
 0x1ce   : > { %v2513_v38 = vpop.eup %2512  ;;  %v4244_v41 = vmul.f32 %v2818_v19, %v2511_v47  ;;  %2518 = vpow2.f32 %v1258_v33  ;;  %v1262_v33 = vmul.f32 1.442695, %v1215_v42 }
 0x1cf   : > { %v2515_v29 = vpop.eup %2514  ;;  %v4249_v18 = vmul.f32 %v2818_v19, %v2513_v38  ;;  %2520 = vpow2.f32 %v1256_v8  ;;  %v1264_v24 = vmul.f32 1.442695, %v1216_v63  ;;  %v1220_v8 = vmul.f32 %v4173_v28, %v5093_v58 }
 0x1d0   : > { %v4254_v48 = vmul.f32 %v2818_v19, %v2515_v29  ;;  %v2517_v47 = vpop.eup %2516  ;;  %2522 = vpow2.f32 %v1266_v43  ;;  %v1219_v29 = vmul.f32 %v4173_v28, %v5095_v62  ;;  %v1218_v63 = vmul.f32 %v4173_v28, %v5096_v26 }
 0x1d1   : > { %v4262_v16 = vmul.f32 %v2818_v19, %v2517_v47  ;;  %2524 = vpow2.f32 %v1264_v24  ;;  %v1272_v43 = vmul.f32 1.442695, %v1220_v8 }
 0x1d2   : > { %1344 = vadd.xlane.f32.xlu2 %v4226_v27  ;;  %2526 = vpow2.f32 %v1262_v33  ;;  %v1270_v44 = vmul.f32 1.442695, %v1219_v29  ;;  %v1268_v24 = vmul.f32 1.442695, %v1218_v63  ;;  %v1223_v33 = vmul.f32 %v4173_v28, %v5097_v36 }
 0x1d3   : > { %1342 = vadd.xlane.f32.xlu1 %v4231_v39  ;;  %5094 = vst [vmem:[#allocation98_spill] sm:$0xff] %v4262_v16  ;;  %2528 = vpow2.f32 %v1272_v43  ;;  %v1221_v29 = vmul.f32 %v4173_v28, %v5099_v40 }
 0x1d4   : > { %1340 = vadd.xlane.f32.xlu0 %v4236_v50  ;;  %v2519_v45 = vpop.eup %2518  ;;  %2530 = vpow2.f32 %v1270_v44  ;;  %v1278_v43 = vmul.f32 1.442695, %v1223_v33 }
 0x1d5   : > { %v2521_v38 = vpop.eup %2520  ;;  %v4267_v32 = vmul.f32 %v2818_v19, %v2519_v45  ;;  %2532 = vpow2.f32 %v1268_v24  ;;  %v1274_v44 = vmul.f32 1.442695, %v1221_v29  ;;  %v1226_v24 = vmul.f32 %v4173_v28, %v5101_v12 }
 0x1d6   : > { %v4272_v42 = vmul.f32 %v2818_v19, %v2521_v38  ;;  %v2523_v47 = vpop.eup %2522  ;;  %v1222_v38 = vmul.f32 %v4173_v28, %v5098_v57  ;;  %2534 = vpow2.f32 %v1278_v43 }
 0x1d7   : > { %v2525_v52 = vpop.eup %2524  ;;  %v4280_v26 = vmul.f32 %v2814_v4, %v2523_v47  ;;  %v1284_v43 = vmul.f32 1.442695, %v1226_v24 }
 0x1d8   : > { %v2527_v45 = vpop.eup %2526  ;;  %v4285_v8 = vmul.f32 %v2814_v4, %v2525_v52  ;;  %v1276_v36 = vmul.f32 1.442695, %v1222_v38  ;;  %v1224_v38 = vmul.f32 %v4173_v28, %v5105_v22 }
 0x1d9   : > { %v4290_v63 = vmul.f32 %v2818_v19, %v2527_v45  ;;  %v2529_v47 = vpop.eup %2528  ;;  %v1225_v45 = vmul.f32 %v4173_v28, %v5103_v31 }
 0x1da   : > { %1350 = vadd.xlane.f32.xlu2 %v4244_v41  ;;  %v2531_v53 = vpop.eup %2530  ;;  %v4298_v40 = vmul.f32 %v2814_v4, %v2529_v47  ;;  %2536 = vpow2.f32 %v1276_v36  ;;  %v1280_v36 = vmul.f32 1.442695, %v1224_v38  ;;  %v5111_v38 = vld [vmem:[#allocation57_spill] sm:$0xff] }
 0x1db   : > { %1348 = vadd.xlane.f32.xlu1 %v4249_v18  ;;  %5100 = vst [vmem:[#allocation99_spill] sm:$0xff] %v4290_v63  ;;  %v2533_v52 = vpop.eup %2532  ;;  %v4303_v33 = vmul.f32 %v2814_v4, %v2531_v53  ;;  %2538 = vpow2.f32 %v1274_v44  ;;  %v1282_v12 = vmul.f32 1.442695, %v1225_v45  ;;  %v1229_v44 = vmul.f32 %v4173_v28, %v5107_v0 }
 0x1dc   : > { %1346 = vadd.xlane.f32.xlu0 %v4254_v48  ;;  %5102 = vst [vmem:[#allocation100_spill] sm:$0xff] %v4298_v40  ;;  %v4308_v29 = vmul.f32 %v2814_v4, %v2533_v52  ;;  %v2535_v47 = vpop.eup %2534  ;;  %2540 = vpow2.f32 %v1284_v43  ;;  %v5109_v52 = vld [vmem:[#allocation63_spill] sm:$0xff]  ;;  %v1227_v31 = vmul.f32 %v4173_v28, %v5111_v38 }
 0x1dd   : > { %5104 = vst [vmem:[#allocation101_spill] sm:$0xff] %v4303_v33  ;;  %v4316_v22 = vmul.f32 %v2814_v4, %v2535_v47  ;;  %2542 = vpow2.f32 %v1282_v12  ;;  %v1228_v24 = vmul.f32 %v4173_v28, %v5109_v52  ;;  %v1290_v43 = vmul.f32 1.442695, %v1229_v44  ;;  %v5114_v52 = vld [vmem:[#allocation64_spill] sm:$0xff] }
 0x1de   : > { %5106 = vst [vmem:[#allocation102_spill] sm:$0xff] %v4308_v29  ;;  %2544 = vpow2.f32 %v1280_v36  ;;  %v1286_v12 = vmul.f32 1.442695, %v1227_v31 }
 0x1df   : > { %5108 = vst [vmem:[#allocation103_spill] sm:$0xff] %v4316_v22  ;;  %v1288_v0 = vmul.f32 1.442695, %v1228_v24  ;;  %2546 = vpow2.f32 %v1290_v43  ;;  %v5116_v24 = vld [vmem:[#allocation60_spill] sm:$0xff] }
 0x1e0   : > { %v2537_v57 = vpop.eup %2536  ;;  %v1230_v38 = vmul.f32 %v4173_v28, %v5116_v24 }
 0x1e1   : > { %v2539_v53 = vpop.eup %2538  ;;  %v4321_v45 = vmul.f32 %v2814_v4, %v2537_v57  ;;  %2548 = vpow2.f32 %v1288_v0 }
 0x1e2   : > { %1356 = vadd.xlane.f32.xlu2 %v4262_v16  ;;  %v4326_v58 = vmul.f32 %v2814_v4, %v2539_v53  ;;  %v2541_v47 = vpop.eup %2540  ;;  %v1231_v53 = vmul.f32 %v4173_v28, %v5114_v52  ;;  %2550 = vpow2.f32 %v1286_v12  ;;  %v1292_v0 = vmul.f32 1.442695, %v1230_v38 }
 0x1e3   : > { %1354 = vadd.xlane.f32.xlu1 %v4267_v32  ;;  %5110 = vst [vmem:[#allocation104_spill] sm:$0xff] %v4321_v45  ;;  %v2543_v59 = vpop.eup %2542  ;;  %v4332_v36 = vmul.f32 %v2814_v4, %v2541_v47 }
 0x1e4   : > { %1352 = vadd.xlane.f32.xlu0 %v4272_v42  ;;  %5112 = vst [vmem:[#allocation105_spill] sm:$0xff] %v4326_v58  ;;  %v2545_v57 = vpop.eup %2544  ;;  %v4337_v44 = vmul.f32 %v2814_v4, %v2543_v59  ;;  %v1294_v43 = vmul.f32 1.442695, %v1231_v53 }
 0x1e5   : > { %5113 = vst [vmem:[#allocation106_spill] sm:$0xff] %v4332_v36  ;;  %v4342_v31 = vmul.f32 %v2814_v4, %v2545_v57  ;;  %v2547_v62 = vpop.eup %2546 }
 0x1e6   : > { %5115 = vst [vmem:[#allocation107_spill] sm:$0xff] %v4337_v44  ;;  %v4348_v59 = vmul.f32 %v2814_v4, %v2547_v62  ;;  %2552 = vpow2.f32 %v1294_v43 }
 0x1e7   : > { %5117 = vst [vmem:[#allocation108_spill] sm:$0xff] %v4342_v31  ;;  %v2549_v47 = vpop.eup %2548  ;;  %2554 = vpow2.f32 %v1292_v0 }
 0x1e8   : > { %v2551_v52 = vpop.eup %2550  ;;  %5118 = vst [vmem:[#allocation109_spill] sm:$0xff] %v4348_v59  ;;  %v4351_v28 = vmul.f32 %v2814_v4, %v2549_v47 }
 0x1e9   : > { %v4354_v12 = vmul.f32 %v2814_v4, %v2551_v52 }
 0x1ea   : > { %1362 = vadd.xlane.f32.xlu2 %v4280_v26  ;;  %5119 = vst [vmem:[#allocation110_spill] sm:$0xff] %v4351_v28 }
 0x1eb   : > { %1360 = vadd.xlane.f32.xlu1 %v4285_v8  ;;  %5120 = vst [vmem:[#allocation111_spill] sm:$0xff] %v4354_v12 }
 0x1ec   : > { %1358 = vadd.xlane.f32.xlu0 %v4290_v63  ;;  %v2553_v57 = vpop.eup %2552 }
 0x1ed   : > { %v2555_v53 = vpop.eup %2554  ;;  %v4360_v24 = vmul.f32 %v2814_v4, %v2553_v57 }
 0x1ee   : > { %v4363_v62 = vmul.f32 %v2814_v4, %v2555_v53 }
 0x1ef   : > { %5121 = vst [vmem:[#allocation112_spill] sm:$0xff] %v4360_v24 }
 0x1f0   : > { %5122 = vst [vmem:[#allocation113_spill] sm:$0xff] %v4363_v62 }
 0x1f2   : > { %1368 = vadd.xlane.f32.xlu2 %v4298_v40 }
 0x1f3   : > { %1366 = vadd.xlane.f32.xlu1 %v4303_v33 }
 0x1f4   : > { %1364 = vadd.xlane.f32.xlu0 %v4308_v29 }
 0x1fa   : > { %1374 = vadd.xlane.f32.xlu2 %v4316_v22 }
 0x1fb   : > { %1372 = vadd.xlane.f32.xlu1 %v4321_v45 }
 0x1fc   : > { %1370 = vadd.xlane.f32.xlu0 %v4326_v58 }
 0x202   : > { %1380 = vadd.xlane.f32.xlu2 %v4332_v36 }
 0x203   : > { %1378 = vadd.xlane.f32.xlu1 %v4337_v44 }
 0x204   : > { %1376 = vadd.xlane.f32.xlu0 %v4342_v31 }
 0x20a   : > { %1386 = vadd.xlane.f32.xlu2 %v4348_v59 }
 0x20b   : > { %1384 = vadd.xlane.f32.xlu1 %v4351_v28 }
 0x20c   : > { %1382 = vadd.xlane.f32.xlu0 %v4354_v12 }
 0x213   : > { %1390 = vadd.xlane.f32.xlu1 %v4360_v24 }
 0x214   : > { %1388 = vadd.xlane.f32.xlu0 %v4363_v62 }
 0x22d   : > { %v1333_v43 = vpop.xlane.xlu1 %1332 }
 0x22e   : > { %v1394_v52 = vadd.f32 1e-09, %v1333_v43 }
 0x234   : > { %v1337_v38 = vpop.xlane.xlu2 %1336 }
 0x235   : > { %v1396_v19 = vadd.f32 1e-09, %v1337_v38 }
 0x236   : > { %v1329_v0 = vpop.xlane.xlu0 %1328 }
 0x237   : > { %v1392_v47 = vadd.f32 1e-09, %v1329_v0 }
 0x239   : > { %2556 = vrcp.f32 %v1392_v47 }
 0x23a   : > { %2558 = vrcp.f32 %v1394_v52 }
 0x23b   : > { %2560 = vrcp.f32 %v1396_v19 }
 0x23d   : > { %v1339_v59 = vpop.xlane.xlu2 %1338 }
 0x23e   : > { %v1335_v28 = vpop.xlane.xlu1 %1334  ;;  %v1397_v24 = vadd.f32 1e-09, %v1339_v59 }
 0x23f   : > { %v1395_v12 = vadd.f32 1e-09, %v1335_v28  ;;  %v1331_v57 = vpop.xlane.xlu0 %1330  ;;  %v2557_v44 = vpop.eup %2556 }
 0x240   : > { %v1393_v36 = vadd.f32 1e-09, %v1331_v57  ;;  %v2559_v53 = vpop.eup %2558  ;;  %v1456_v4 = vmul.f32 %v2557_v44, %v1392_v47 }
 0x241   : > { %v2561_v22 = vpop.eup %2560  ;;  %v1458_v0 = vmul.f32 %v2559_v53, %v1394_v52 }
 0x242   : > { %2562 = vrcp.f32 %v1393_v36  ;;  %v1488_v58 = vsub.f32 2.0, %v1456_v4  ;;  %v1460_v57 = vmul.f32 %v2561_v22, %v1396_v19 }
 0x243   : > { %2564 = vrcp.f32 %v1395_v12  ;;  %v1490_v63 = vsub.f32 2.0, %v1458_v0 }
 0x244   : > { %2566 = vrcp.f32 %v1397_v24  ;;  %v1520_v33 = vmul.f32 %v2557_v44, %v1488_v58  ;;  %v1492_v52 = vsub.f32 2.0, %v1460_v57 }
 0x245   : > { %v1345_v62 = vpop.xlane.xlu2 %1344  ;;  %v1522_v23 = vmul.f32 %v2559_v53, %v1490_v63 }
 0x246   : > { %v1343_v31 = vpop.xlane.xlu1 %1342  ;;  %v1400_v40 = vadd.f32 1e-09, %v1345_v62  ;;  %v1552_v19 = vmul.f32 %v2946_v61, %v1520_v33 }
 0x247   : > { %v1399_v43 = vadd.f32 1e-09, %v1343_v31  ;;  %v1341_v45 = vpop.xlane.xlu0 %1340  ;;  %v1554_v33 = vmul.f32 %v2938_v55, %v1522_v23 }
 0x248   : > { %v2563_v38 = vpop.eup %2562  ;;  %v1398_v54 = vadd.f32 1e-09, %v1341_v45  ;;  %v4373_v63 = vmul.f32 %v1552_v19, %v4201_v46 }
 0x249   : > { %v2565_v28 = vpop.eup %2564  ;;  %v1457_v3 = vmul.f32 %v2563_v38, %v1393_v36  ;;  %2568 = vrcp.f32 %v1399_v43  ;;  %v4381_v23 = vmul.f32 %v1554_v33, %v4197_v9 }
 0x24a   : > { %v1459_v47 = vmul.f32 %v2565_v28, %v1395_v12  ;;  %2570 = vrcp.f32 %v1398_v54  ;;  %v2567_v29 = vpop.eup %2566 }
 0x24b   : > { %v1489_v16 = vsub.f32 2.0, %v1457_v3  ;;  %2572 = vrcp.f32 %v1400_v40  ;;  %v1461_v58 = vmul.f32 %v2567_v29, %v1397_v24 }
 0x24c   : > { %v1491_v36 = vsub.f32 2.0, %v1459_v47 }
 0x24d   : > { %v1521_v59 = vmul.f32 %v2563_v38, %v1489_v16  ;;  %v1351_v51 = vpop.xlane.xlu2 %1350  ;;  %v1524_v16 = vmul.f32 %v2561_v22, %v1492_v52  ;;  %v1493_v57 = vsub.f32 2.0, %v1461_v58 }
 0x24e   : > { %v1349_v31 = vpop.xlane.xlu1 %1348  ;;  %v1403_v62 = vadd.f32 1e-09, %v1351_v51  ;;  %v1523_v53 = vmul.f32 %v2565_v28, %v1491_v36 }
 0x24f   : > { %v1553_v4 = vmul.f32 %v2942_v15, %v1521_v59  ;;  %v1402_v45 = vadd.f32 1e-09, %v1349_v31  ;;  %v1347_v25 = vpop.xlane.xlu0 %1346  ;;  %v2569_v0 = vpop.eup %2568  ;;  %v1556_v24 = vmul.f32 %v2930_v20, %v1524_v16 }
 0x250   : > { %v1401_v3 = vadd.f32 1e-09, %v1347_v25  ;;  %v2571_v44 = vpop.eup %2570  ;;  %v1463_v51 = vmul.f32 %v2569_v0, %v1399_v43  ;;  %v1555_v28 = vmul.f32 %v2934_v35, %v1523_v53 }
 0x251   : > { %2574 = vrcp.f32 %v1402_v45  ;;  %v4370_v12 = vmul.f32 %v1553_v4, %v4218_v1  ;;  %v2573_v38 = vpop.eup %2572  ;;  %v1462_v25 = vmul.f32 %v2571_v44, %v1398_v54  ;;  %v1525_v54 = vmul.f32 %v2567_v29, %v1493_v57 }
 0x252   : > { %2576 = vrcp.f32 %v1401_v3  ;;  %v1464_v31 = vmul.f32 %v2573_v38, %v1400_v40  ;;  %v1495_v43 = vsub.f32 2.0, %v1463_v51  ;;  %v4388_v53 = vmul.f32 %v1555_v28, %v4213_v34 }
 0x253   : > { %2578 = vrcp.f32 %v1403_v62  ;;  %v1616_v1 = vadd.f32 %v4370_v12, %v4373_v63  ;;  %v1494_v58 = vsub.f32 2.0, %v1462_v25  ;;  %v1557_v9 = vmul.f32 %v2926_v6, %v1525_v54 }
 0x254   : > { %v1496_v61 = vsub.f32 2.0, %v1464_v31  ;;  %v1527_v29 = vmul.f32 %v2569_v0, %v1495_v43 }
 0x255   : > { %v1357_v47 = vpop.xlane.xlu2 %1356  ;;  %v1617_v20 = vadd.f32 %v1616_v1, %v4381_v23  ;;  %v1526_v33 = vmul.f32 %v2571_v44, %v1494_v58 }
 0x256   : > { %v1406_v59 = vadd.f32 1e-09, %v1357_v47  ;;  %v1355_v22 = vpop.xlane.xlu1 %1354  ;;  %v1559_v28 = vmul.f32 %v2918_v56, %v1527_v29 }
 0x257   : > { %v2575_v52 = vpop.eup %2574  ;;  %v1405_v4 = vadd.f32 1e-09, %v1355_v22  ;;  %v1353_v46 = vpop.xlane.xlu0 %1352  ;;  %v4385_v22 = vmul.f32 %v1556_v24, %v4194_v14  ;;  %v1618_v1 = vadd.f32 %v1617_v20, %v4388_v53  ;;  %v1558_v0 = vmul.f32 %v2922_v21, %v1526_v33 }
 0x258   : > { %v2577_v19 = vpop.eup %2576  ;;  %v1404_v36 = vadd.f32 1e-09, %v1353_v46  ;;  %v1466_v47 = vmul.f32 %v2575_v52, %v1402_v45 }
 0x259   : > { %2580 = vrcp.f32 %v1405_v4  ;;  %v2579_v16 = vpop.eup %2578  ;;  %v1465_v40 = vmul.f32 %v2577_v19, %v1401_v3  ;;  %v1528_v3 = vmul.f32 %v2573_v38, %v1496_v61  ;;  %v1619_v20 = vadd.f32 %v1618_v1, %v4385_v22 }
 0x25a   : > { %2582 = vrcp.f32 %v1406_v59  ;;  %v1467_v57 = vmul.f32 %v2579_v16, %v1403_v62  ;;  %v1498_v25 = vsub.f32 2.0, %v1466_v47  ;;  %v4396_v61 = vmul.f32 %v1557_v9, %v4208_v2 }
 0x25b   : > { %2584 = vrcp.f32 %v1404_v36  ;;  %v1497_v35 = vsub.f32 2.0, %v1465_v40  ;;  %v4400_v47 = vmul.f32 %v1559_v28, %v4231_v39  ;;  %v4403_v40 = vmul.f32 %v1558_v0, %v4236_v50 }
 0x25c   : > { %v1499_v62 = vsub.f32 2.0, %v1467_v57  ;;  %v1530_v44 = vmul.f32 %v2575_v52, %v1498_v25 }
 0x25d   : > { %v1363_v51 = vpop.xlane.xlu2 %1362  ;;  %v1529_v38 = vmul.f32 %v2577_v19, %v1497_v35  ;;  %v1620_v35 = vadd.f32 %v1619_v20, %v4396_v61 }
 0x25e   : > { %v1409_v45 = vadd.f32 1e-09, %v1363_v51  ;;  %v1361_v46 = vpop.xlane.xlu1 %1360  ;;  %v1531_v29 = vmul.f32 %v2579_v16, %v1499_v62  ;;  %v1562_v33 = vmul.f32 %v2906_v11, %v1530_v44 }
 0x25f   : > { %v2581_v31 = vpop.eup %2580  ;;  %v1359_v15 = vpop.xlane.xlu0 %1358  ;;  %v1408_v14 = vadd.f32 1e-09, %v1361_v46  ;;  %v1561_v19 = vmul.f32 %v2910_v37, %v1529_v38  ;;  %v1621_v44 = vadd.f32 %v1620_v35, %v4403_v40 }
 0x260   : > { %v2583_v24 = vpop.eup %2582  ;;  %v1407_v55 = vadd.f32 1e-09, %v1359_v15  ;;  %2586 = vrcp.f32 %v1409_v45  ;;  %v1469_v54 = vmul.f32 %v2581_v31, %v1405_v4  ;;  %v1560_v15 = vmul.f32 %v2914_v17, %v1528_v3 }
 0x261   : > { %v2585_v34 = vpop.eup %2584  ;;  %2588 = vrcp.f32 %v1408_v14  ;;  %v1470_v43 = vmul.f32 %v2583_v24, %v1406_v59 }
 0x262   : > { %2590 = vrcp.f32 %v1407_v55  ;;  %v1468_v58 = vmul.f32 %v2585_v34, %v1404_v36  ;;  %v1501_v57 = vsub.f32 2.0, %v1469_v54  ;;  %v4410_v54 = vmul.f32 %v1560_v15, %v4226_v27 }
 0x263   : > { %v1502_v36 = vsub.f32 2.0, %v1470_v43 }
 0x264   : > { %v1500_v50 = vsub.f32 2.0, %v1468_v58  ;;  %v1533_v0 = vmul.f32 %v2581_v31, %v1501_v57  ;;  %v4415_v58 = vmul.f32 %v1562_v33, %v4249_v18 }
 0x265   : > { %v1369_v52 = vpop.xlane.xlu2 %1368 }
 0x266   : > { %v2587_v4 = vpop.eup %2586  ;;  %v1412_v51 = vadd.f32 1e-09, %v1369_v52  ;;  %v1367_v2 = vpop.xlane.xlu1 %1366  ;;  %v1532_v38 = vmul.f32 %v2585_v34, %v1500_v50  ;;  %v1565_v27 = vmul.f32 %v2894_v10, %v1533_v0 }
 0x267   : > { %v2589_v59 = vpop.eup %2588  ;;  %v1473_v9 = vmul.f32 %v2587_v4, %v1409_v45  ;;  %v1365_v39 = vpop.xlane.xlu0 %1364  ;;  %v1411_v25 = vadd.f32 1e-09, %v1367_v2  ;;  %v1563_v45 = vmul.f32 %v2902_v5, %v1531_v29  ;;  %v1534_v2 = vmul.f32 %v2583_v24, %v1502_v36 }
 0x268   : > { %v2591_v46 = vpop.eup %2590  ;;  %v1472_v1 = vmul.f32 %v2589_v59, %v1408_v14  ;;  %v1410_v16 = vadd.f32 1e-09, %v1365_v39  ;;  %2592 = vrcp.f32 %v1412_v51  ;;  %v1622_v14 = vadd.f32 %v1621_v44, %v4400_v47 }
 0x269   : > { %v1471_v3 = vmul.f32 %v2591_v46, %v1407_v55  ;;  %v1505_v28 = vsub.f32 2.0, %v1473_v9  ;;  %2594 = vrcp.f32 %v1411_v25  ;;  %v4418_v55 = vmul.f32 %v1561_v19, %v4254_v48 }
 0x26a   : > { %v1504_v62 = vsub.f32 2.0, %v1472_v1  ;;  %2596 = vrcp.f32 %v1410_v16  ;;  %v1623_v18 = vadd.f32 %v1622_v14, %v4410_v54  ;;  %v1564_v19 = vmul.f32 %v2898_v7, %v1532_v38 }
 0x26b   : > { %v1537_v20 = vmul.f32 %v2587_v4, %v1505_v28  ;;  %v1503_v31 = vsub.f32 2.0, %v1471_v3  ;;  %v4433_v44 = vmul.f32 %v1563_v45, %v4244_v41 }
 0x26c   : > { %v1536_v43 = vmul.f32 %v2589_v59, %v1504_v62  ;;  %v1624_v28 = vadd.f32 %v1623_v18, %v4418_v55 }
 0x26d   : > { %v1375_v52 = vpop.xlane.xlu2 %1374  ;;  %v1569_v33 = vmul.f32 %v2878_v49, %v1537_v20  ;;  %v1535_v24 = vmul.f32 %v2591_v46, %v1503_v31  ;;  %v4441_v20 = vmul.f32 %v1564_v19, %v4272_v42  ;;  %v5139_v49 = vld [vmem:[#allocation108_spill] sm:$0xff] }
 0x26e   : > { %v2593_v57 = vpop.eup %2592  ;;  %v1568_v15 = vmul.f32 %v2882_v60, %v1536_v43  ;;  %v1415_v29 = vadd.f32 1e-09, %v1375_v52  ;;  %v1373_v4 = vpop.xlane.xlu1 %1372  ;;  %v1625_v46 = vadd.f32 %v1624_v28, %v4415_v58 }
 0x26f   : > { %v2595_v34 = vpop.eup %2594  ;;  %v1476_v35 = vmul.f32 %v2593_v57, %v1412_v51  ;;  %v1371_v59 = vpop.xlane.xlu0 %1370  ;;  %v1414_v9 = vadd.f32 1e-09, %v1373_v4  ;;  %v4430_v62 = vmul.f32 %v1569_v33, %v4280_v26  ;;  %v1567_v26 = vmul.f32 %v2886_v13, %v1535_v24  ;;  %v5123_v4 = vld [vmem:[#allocation87_spill] sm:$0xff] }
 0x270   : > { %v2597_v48 = vpop.eup %2596  ;;  %v1475_v39 = vmul.f32 %v2595_v34, %v1411_v25  ;;  %v1413_v50 = vadd.f32 1e-09, %v1371_v59  ;;  %2598 = vrcp.f32 %v1415_v29  ;;  %v4426_v1 = vmul.f32 %v1568_v15, %v4285_v8 }
 0x271   : > { %v1474_v36 = vmul.f32 %v2597_v48, %v1410_v16  ;;  %2600 = vrcp.f32 %v1414_v9  ;;  %v1508_v3 = vsub.f32 2.0, %v1476_v35  ;;  %v1566_v16 = vmul.f32 %v2890_v30, %v1534_v2 }
 0x272   : > { %v1507_v51 = vsub.f32 2.0, %v1475_v39  ;;  %2602 = vrcp.f32 %v1413_v50  ;;  %v4438_v8 = vmul.f32 %v1565_v27, %v4267_v32  ;;  %v1637_v45 = vadd.f32 %v4430_v62, %v4426_v1 }
 0x273   : > { %v1506_v0 = vsub.f32 2.0, %v1474_v36  ;;  %v1540_v31 = vmul.f32 %v2593_v57, %v1508_v3  ;;  %v5125_v57 = vld [vmem:[#allocation102_spill] sm:$0xff]  ;;  %v5126_v36 = vld [vmem:[#allocation85_spill] sm:$0xff] }
 0x274   : > { %v1539_v25 = vmul.f32 %v2595_v34, %v1507_v51  ;;  %v5124_v34 = vld [vmem:[#allocation86_spill] sm:$0xff] }
 0x275   : > { %v1538_v38 = vmul.f32 %v2597_v48, %v1506_v0  ;;  %v1381_v43 = vpop.xlane.xlu2 %1380  ;;  %v1626_v48 = vadd.f32 %v1625_v46, %v4433_v44  ;;  %v1572_v3 = vmul.f32 %v5126_v36, %v1540_v31 }
 0x276   : > { %v2599_v14 = vpop.eup %2598  ;;  %v1418_v52 = vadd.f32 1e-09, %v1381_v43  ;;  %v1379_v41 = vpop.xlane.xlu1 %1378  ;;  %v1571_v32 = vmul.f32 %v5124_v34, %v1539_v25  ;;  %v5128_v43 = vld [vmem:[#allocation98_spill] sm:$0xff] }
 0x277   : > { %v2601_v15 = vpop.eup %2600  ;;  %v1570_v2 = vmul.f32 %v5123_v4, %v1538_v38  ;;  %v1479_v27 = vmul.f32 %v2599_v14, %v1415_v29  ;;  %v1377_v35 = vpop.xlane.xlu0 %1376  ;;  %v1417_v42 = vadd.f32 1e-09, %v1379_v41  ;;  %v1627_v29 = vadd.f32 %v1626_v48, %v4441_v20  ;;  %v5130_v48 = vld [vmem:[#allocation100_spill] sm:$0xff] }
 0x278   : > { %v2603_v59 = vpop.eup %2602  ;;  %v1478_v18 = vmul.f32 %v2601_v15, %v1414_v9  ;;  %v1416_v33 = vadd.f32 1e-09, %v1377_v35  ;;  %2604 = vrcp.f32 %v1418_v52  ;;  %v5127_v9 = vld [vmem:[#allocation101_spill] sm:$0xff]  ;;  %v4460_v41 = vmul.f32 %v1566_v16, %v5128_v43  ;;  %v5129_v35 = vld [vmem:[#allocation99_spill] sm:$0xff] }
 0x279   : > { %v4450_v19 = vmul.f32 %v1570_v2, %v5125_v57  ;;  %v1477_v39 = vmul.f32 %v2603_v59, %v1413_v50  ;;  %v1511_v24 = vsub.f32 2.0, %v1479_v27  ;;  %2606 = vrcp.f32 %v1417_v42 }
 0x27a   : > { %v1510_v51 = vsub.f32 2.0, %v1478_v18  ;;  %2608 = vrcp.f32 %v1416_v33  ;;  %v4456_v25 = vmul.f32 %v1571_v32, %v5127_v9  ;;  %v1628_v46 = vadd.f32 %v1627_v29, %v4438_v8  ;;  %v5132_v9 = vld [vmem:[#allocation83_spill] sm:$0xff] }
 0x27b   : > { %v1509_v28 = vsub.f32 2.0, %v1477_v39  ;;  %v1638_v0 = vadd.f32 %v1637_v45, %v4450_v19  ;;  %v1543_v2 = vmul.f32 %v2599_v14, %v1511_v24  ;;  %v4463_v18 = vmul.f32 %v1567_v26, %v5129_v35 }
 0x27c   : > { %v1542_v38 = vmul.f32 %v2601_v15, %v1510_v51  ;;  %v4466_v57 = vmul.f32 %v1572_v3, %v5130_v48  ;;  %v5131_v51 = vld [vmem:[#allocation84_spill] sm:$0xff]  ;;  %v1629_v26 = vadd.f32 %v1628_v46, %v4460_v41  ;;  %v5133_v3 = vld [vmem:[#allocation105_spill] sm:$0xff] }
 0x27d   : > { %v1541_v50 = vmul.f32 %v2603_v59, %v1509_v28  ;;  %v1387_v27 = vpop.xlane.xlu2 %1386  ;;  %v1639_v32 = vadd.f32 %v1638_v0, %v4456_v25 }
 0x27e   : > { %v2605_v31 = vpop.eup %2604  ;;  %v1421_v45 = vadd.f32 1e-09, %v1387_v27  ;;  %v1385_v39 = vpop.xlane.xlu1 %1384  ;;  %v1574_v16 = vmul.f32 %v5132_v9, %v1542_v38  ;;  %v5134_v27 = vld [vmem:[#allocation82_spill] sm:$0xff]  ;;  %v1630_v38 = vadd.f32 %v1629_v26, %v4463_v18 }
 0x27f   : > { %v2607_v15 = vpop.eup %2606  ;;  %v1573_v29 = vmul.f32 %v5131_v51, %v1541_v50  ;;  %v1482_v43 = vmul.f32 %v2605_v31, %v1418_v52  ;;  %v1383_v59 = vpop.xlane.xlu0 %1382  ;;  %v1420_v14 = vadd.f32 1e-09, %v1385_v39  ;;  %v1575_v48 = vmul.f32 %v5134_v27, %v1543_v2  ;;  %v5136_v2 = vld [vmem:[#allocation103_spill] sm:$0xff] }
 0x280   : > { %v2609_v24 = vpop.eup %2608  ;;  %v1481_v28 = vmul.f32 %v2607_v15, %v1417_v42  ;;  %v1419_v36 = vadd.f32 1e-09, %v1383_v59  ;;  %2610 = vrcp.f32 %v1421_v45  ;;  %v1640_v52 = vadd.f32 %v1639_v32, %v4466_v57  ;;  %v5135_v42 = vld [vmem:[#allocation104_spill] sm:$0xff]  ;;  %v5137_v32 = vld [vmem:[#allocation81_spill] sm:$0xff] }
 0x281   : > { %v4473_v35 = vmul.f32 %v1573_v29, %v5133_v3  ;;  %v1480_v0 = vmul.f32 %v2609_v24, %v1416_v33  ;;  %2612 = vrcp.f32 %v1420_v14  ;;  %v1514_v39 = vsub.f32 2.0, %v1482_v43 }
 0x282   : > { %v1513_v4 = vsub.f32 2.0, %v1481_v28  ;;  %2614 = vrcp.f32 %v1419_v36  ;;  %v4479_v59 = vmul.f32 %v1574_v16, %v5135_v42  ;;  %v1631_v46 = vrot.slane %v1630_v38, 4 }
 0x283   : > { %v1512_v50 = vsub.f32 2.0, %v1480_v0  ;;  %v1641_v29 = vadd.f32 %v1640_v52, %v4473_v35  ;;  %v4483_v33 = vmul.f32 %v1575_v48, %v5136_v2  ;;  %v1546_v43 = vmul.f32 %v2605_v31, %v1514_v39  ;;  %v5140_v31 = vld [vmem:[#allocation79_spill] sm:$0xff] }
 0x284   : > { %v1545_v9 = vmul.f32 %v2607_v15, %v1513_v4  ;;  %v1632_v27 = vadd.f32 %v1631_v46, %v1630_v38  ;;  %v5138_v15 = vld [vmem:[#allocation80_spill] sm:$0xff] }
 0x285   : > { %v1544_v3 = vmul.f32 %v2609_v24, %v1512_v50  ;;  %v1642_v26 = vadd.f32 %v1641_v29, %v4479_v59 }
 0x286   : > { %v2611_v51 = vpop.eup %2610  ;;  %v1391_v28 = vpop.xlane.xlu1 %1390  ;;  %v1577_v60 = vmul.f32 %v5138_v15, %v1545_v9  ;;  %v1633_v50 = vrot.slane %v1632_v27, 2  ;;  %v5142_v15 = vld [vmem:[#allocation106_spill] sm:$0xff] }
 0x287   : > { %v2613_v34 = vpop.eup %2612  ;;  %v1576_v0 = vmul.f32 %v5137_v32, %v1544_v3  ;;  %v1485_v13 = vmul.f32 %v2611_v51, %v1421_v45  ;;  %v1389_v16 = vpop.xlane.xlu0 %1388  ;;  %v1423_v42 = vadd.f32 1e-09, %v1391_v28  ;;  %v1643_v29 = vadd.f32 %v1642_v26, %v4483_v33  ;;  %v5141_v28 = vld [vmem:[#allocation107_spill] sm:$0xff]  ;;  %v5143_v26 = vld [vmem:[#allocation78_spill] sm:$0xff] }
 0x288   : > { %v2615_v4 = vpop.eup %2614  ;;  %v1484_v52 = vmul.f32 %v2613_v34, %v1420_v14  ;;  %v1422_v24 = vadd.f32 1e-09, %v1389_v16  ;;  %v1634_v46 = vadd.f32 %v1633_v50, %v1632_v27  ;;  %v1578_v45 = vmul.f32 %v5140_v31, %v1546_v43 }
 0x289   : > { %v4489_v48 = vmul.f32 %v1576_v0, %v5139_v49  ;;  %v1483_v2 = vmul.f32 %v2615_v4, %v1419_v36  ;;  %2616 = vrcp.f32 %v1423_v42  ;;  %v1517_v3 = vsub.f32 2.0, %v1485_v13 }
 0x28a   : > { %v1516_v38 = vsub.f32 2.0, %v1484_v52  ;;  %2618 = vrcp.f32 %v1422_v24  ;;  %v4494_v32 = vmul.f32 %v1577_v60, %v5141_v28  ;;  %v1635_v14 = vrot.slane %v1634_v46, 1 }
 0x28b   : > { %v1515_v39 = vsub.f32 2.0, %v1483_v2  ;;  %v1644_v16 = vadd.f32 %v1643_v29, %v4489_v48  ;;  %v4499_v27 = vmul.f32 %v1578_v45, %v5142_v15  ;;  %v1549_v43 = vmul.f32 %v2611_v51, %v1517_v3  ;;  %v5144_v2 = vld [vmem:[#allocation77_spill] sm:$0xff]  ;;  %v5147_v15 = vld [vmem:[#allocation110_spill] sm:$0xff] }
 0x28c   : > { %v1548_v9 = vmul.f32 %v2613_v34, %v1516_v38  ;;  %v1636_v0 = vadd.f32 %v1635_v14, %v1634_v46  ;;  %v5145_v34 = vld [vmem:[#allocation111_spill] sm:$0xff] }
 0x28d   : > { %v1547_v49 = vmul.f32 %v2615_v4, %v1515_v39  ;;  %v1645_v36 = vadd.f32 %v1644_v16, %v4494_v32  ;;  %v5146_v39 = vld [vmem:[#allocation76_spill] sm:$0xff] }
 0x28e   : > { %v1580_v13 = vmul.f32 %v5144_v2, %v1548_v9  ;;  %v1658_v28 = vadd.f32 1e-09, %v1636_v0  ;;  %v1581_v14 = vmul.f32 %v5146_v39, %v1549_v43  ;;  %v5151_v2 = vld [vmem:[#allocation113_spill] sm:$0xff] }
 0x28f   : > { %v2617_v52 = vpop.eup %2616  ;;  %v1579_v50 = vmul.f32 %v5143_v26, %v1547_v49  ;;  %v1646_v4 = vadd.f32 %v1645_v36, %v4499_v27  ;;  %v5148_v49 = vld [vmem:[#allocation109_spill] sm:$0xff]  ;;  %v5150_v36 = vld [vmem:[#allocation74_spill] sm:$0xff] }
 0x290   : > { %v2619_v31 = vpop.eup %2618  ;;  %v1487_v60 = vmul.f32 %v2617_v52, %v1423_v42  ;;  %2620 = vrcp.f32 %v1658_v28  ;;  %v4509_v45 = vmul.f32 %v1580_v13, %v5147_v15  ;;  %v4514_v0 = vmul.f32 %v1581_v14, %v5148_v49  ;;  %v5152_v15 = vld [vmem:[#allocation112_spill] sm:$0xff] }
 0x291   : > { %v4504_v38 = vmul.f32 %v1579_v50, %v5145_v34  ;;  %v1486_v29 = vmul.f32 %v2619_v31, %v1422_v24  ;;  %v5149_v24 = vld [vmem:[#allocation75_spill] sm:$0xff]  ;;  %v2114_v49 = vadd.f32 -1e-09, %v1658_v28 }
 0x292   : > { %v1519_v46 = vsub.f32 2.0, %v1487_v60 }
 0x293   : > { %v1518_v16 = vsub.f32 2.0, %v1486_v29  ;;  %v1647_v51 = vadd.f32 %v1646_v4, %v4504_v38 }
 0x294   : > { %v1551_v3 = vmul.f32 %v2617_v52, %v1519_v46 }
 0x295   : > { %v1550_v9 = vmul.f32 %v2619_v31, %v1518_v16  ;;  %v1648_v42 = vadd.f32 %v1647_v51, %v4509_v45  ;;  %v5153_v16 = vld [vmem:[#allocation73_spill] sm:$0xff] }
 0x296   : > { %v1583_v60 = vmul.f32 %v5150_v36, %v1551_v3  ;;  %v2621_v34 = vpop.eup %2620 }
 0x297   : > { %v1582_v50 = vmul.f32 %v5149_v24, %v1550_v9  ;;  %v1662_v13 = vmul.f32 %v2621_v34, %v1658_v28  ;;  %v1649_v29 = vadd.f32 %v1648_v42, %v4514_v0 }
 0x298   : > { %v4523_v4 = vmul.f32 %v1583_v60, %v5152_v15 }
 0x299   : > { %v4519_v43 = vmul.f32 %v1582_v50, %v5151_v2  ;;  %v1664_v31 = vsub.f32 2.0, %v1662_v13 }
 0x29b   : > { %v1650_v52 = vadd.f32 %v1649_v29, %v4519_v43  ;;  %v1666_v46 = vmul.f32 %v2621_v34, %v1664_v31 }
 0x29d   : > { %v1651_v14 = vadd.f32 %v1650_v52, %v4523_v4  ;;  %v1668_v51 = vmul.f32 %v5153_v16, %v1666_v46 }
 0x29f   : > { %v1652_v9 = vrot.slane %v1651_v14, 4  ;;  %v4528_v3 = vmin.f32 %v1668_v51, 1.0 }
 0x2a1   : > { %v1653_v2 = vadd.f32 %v1652_v9, %v1651_v14  ;;  %v4532_v50 = vmul.f32 %v4528_v3, %v4381_v23  ;;  %v1974_v42 = vmul.f32 %v2114_v49, %v4528_v3  ;;  %v4537_v60 = vmul.f32 %v4528_v3, %v4370_v12 }
 0x2a2   : > { %v4541_v34 = vmul.f32 %v4528_v3, %v4373_v63  ;;  %v4551_v12 = vmul.f32 %v4528_v3, %v4396_v61  ;;  %v1676_v63 = vmul.f32 %v4528_v3, %v4385_v22  ;;  %v4557_v31 = vmul.f32 %v4528_v3, %v4388_v53 }
 0x2a3   : > { %v1976_v13 = vsub.f32 %v5153_v16, %v1974_v42  ;;  %1848 = vadd.xlane.f32.xlu0 %v4532_v50  ;;  %1846 = vadd.xlane.f32.xlu2 %v4537_v60  ;;  %v1654_v28 = vrot.slane %v1653_v2, 2  ;;  %v4563_v14 = vmul.f32 %v4528_v3, %v4410_v54  ;;  %v1679_v61 = vmul.f32 %v4528_v3, %v4400_v47 }
 0x2a4   : > { %1844 = vadd.xlane.f32.xlu1 %v4541_v34  ;;  %v1678_v22 = vmul.f32 %v4528_v3, %v4403_v40  ;;  %v1683_v9 = vmul.f32 %v4528_v3, %v4433_v44  ;;  %v1682_v54 = vmul.f32 %v4528_v3, %v4415_v58  ;;  %v1681_v47 = vmul.f32 %v4528_v3, %v4418_v55  ;;  %v5154_v40 = vld [vmem:[#allocation72_spill] sm:$0xff] }
 0x2a5   : > { %v4547_v23 = vmax.f32 %v1976_v13, 0.0   ;;  %v1655_v29 = vadd.f32 %v1654_v28, %v1653_v2  ;;  %v1686_v55 = vmul.f32 %v4528_v3, %v4460_v41 }
 0x2a7   : > { %v1656_v15 = vrot.slane %v1655_v29, 1 }
 0x2a9   : > { %v1657_v52 = vadd.f32 %v1656_v15, %v1655_v29  ;;  %v1685_v29 = vmul.f32 %v4528_v3, %v4438_v8 }
 0x2ab   : > { %1854 = vadd.xlane.f32.xlu0 %v4551_v12  ;;  %1852 = vadd.xlane.f32.xlu2 %v1676_v63  ;;  %v1659_v46 = vadd.f32 1e-09, %v1657_v52  ;;  %v1684_v52 = vmul.f32 %v4528_v3, %v4441_v20 }
 0x2ac   : > { %1850 = vadd.xlane.f32.xlu1 %v4557_v31 }
 0x2ad   : > { %2622 = vrcp.f32 %v1659_v46  ;;  %v2115_v13 = vadd.f32 -1e-09, %v1659_v46 }
 0x2b3   : > { %1860 = vadd.xlane.f32.xlu0 %v4563_v14  ;;  %1858 = vadd.xlane.f32.xlu2 %v1679_v61  ;;  %v2623_v53 = vpop.eup %2622 }
 0x2b4   : > { %1856 = vadd.xlane.f32.xlu1 %v1678_v22  ;;  %v1663_v16 = vmul.f32 %v2623_v53, %v1659_v46 }
 0x2b6   : > { %v1665_v51 = vsub.f32 2.0, %v1663_v16 }
 0x2b8   : > { %v1667_v49 = vmul.f32 %v2623_v53, %v1665_v51  ;;  %v5157_v51 = vld [vmem:[#allocation12_spill] sm:$0xff] }
 0x2ba   : > { %v1669_v2 = vmul.f32 %v5154_v40, %v1667_v49 }
 0x2bb   : > { %1866 = vadd.xlane.f32.xlu0 %v1683_v9  ;;  %1864 = vadd.xlane.f32.xlu2 %v1682_v54 }
 0x2bc   : > { %1862 = vadd.xlane.f32.xlu1 %v1681_v47  ;;  %v4577_v42 = vmin.f32 %v1669_v2, 1.0 }
 0x2be   : > { %v1975_v28 = vmul.f32 %v2115_v13, %v4577_v42  ;;  %v4582_v44 = vmul.f32 %v4577_v42, %v4466_v57  ;;  %v4586_v58 = vmul.f32 %v4577_v42, %v4483_v33  ;;  %v4599_v57 = vmul.f32 %v4577_v42, %v4494_v32 }
 0x2bf   : > { %v4603_v33 = vmul.f32 %v4577_v42, %v4499_v27  ;;  %v4607_v8 = vmul.f32 %v4577_v42, %v4489_v48  ;;  %v4611_v20 = vmul.f32 %v4577_v42, %v4509_v45  ;;  %v4615_v41 = vmul.f32 %v4577_v42, %v4514_v0 }
 0x2c0   : > { %v1977_v15 = vsub.f32 %v5154_v40, %v1975_v28  ;;  %v4619_v32 = vmul.f32 %v4577_v42, %v4504_v38  ;;  %v4623_v27 = vmul.f32 %v4577_v42, %v4523_v4  ;;  %v1689_v48 = vmul.f32 %v4577_v42, %v4430_v62  ;;  %v5155_v38 = vld [vmem:[#allocation23_spill] sm:$0xff] }
 0x2c1   : > { %v1688_v53 = vmul.f32 %v4577_v42, %v4426_v1  ;;  %v4631_v45 = vmul.f32 %v4577_v42, %v4519_v43  ;;  %v1687_v0 = vmul.f32 %v4528_v3, %v4463_v18  ;;  %v1705_v4 = vmul.f32 %v4537_v60, %v5155_v38  ;;  %v5156_v1 = vld [vmem:[#allocation31_spill] sm:$0xff]  ;;  %v5158_v3 = vld [vmem:[#allocation24_spill] sm:$0xff]  ;;  %v5164_v38 = vld [vmem:[#allocation22_spill] sm:$0xff] }
 0x2c2   : > { %v4595_v46 = vmax.f32 %v1977_v15, 0.0   ;;  %v1691_v16 = vmul.f32 %v4577_v42, %v4456_v25  ;;  %v1690_v62 = vmul.f32 %v4577_v42, %v4450_v19  ;;  %v1708_v43 = vmul.f32 %v1676_v63, %v5156_v1  ;;  %v5159_v60 = vld [vmem:[#allocation36_spill] sm:$0xff]  ;;  %v5160_v25 = vld [vmem:[#allocation14_spill] sm:$0xff] }
 0x2c3   : > { %1872 = vadd.xlane.f32.xlu0 %v1686_v55  ;;  %1870 = vadd.xlane.f32.xlu2 %v1685_v29  ;;  %v1704_v18 = vmul.f32 %v4541_v34, %v5157_v51  ;;  %v1706_v49 = vmul.f32 %v4532_v50, %v5158_v3  ;;  %v1711_v40 = vmul.f32 %v1679_v61, %v5159_v60  ;;  %v5161_v19 = vld [vmem:[#allocation18_spill] sm:$0xff]  ;;  %v5163_v34 = vld [vmem:[#allocation28_spill] sm:$0xff] }
 0x2c4   : > { %1868 = vadd.xlane.f32.xlu1 %v1684_v52  ;;  %v1707_v2 = vmul.f32 %v4557_v31, %v5160_v25  ;;  %v1709_v13 = vmul.f32 %v4551_v12, %v5161_v19  ;;  %v5162_v63 = vld [vmem:[#allocation42_spill] sm:$0xff]  ;;  %v1710_v15 = vmul.f32 %v1678_v22, %v5163_v34  ;;  %v1712_v50 = vmul.f32 %v4563_v14, %v5164_v38  ;;  %v5165_v61 = vld [vmem:[#allocation48_spill] sm:$0xff]  ;;  %v5168_v12 = vld [vmem:[#allocation41_spill] sm:$0xff] }
 0x2c5   : > { %v1714_v28 = vmul.f32 %v1682_v54, %v5162_v63  ;;  %v5166_v1 = vld [vmem:[#allocation34_spill] sm:$0xff]  ;;  %v5169_v54 = vld [vmem:[#allocation55_spill] sm:$0xff]  ;;  %v5170_v22 = vld [vmem:[#allocation33_spill] sm:$0xff] }
 0x2c6   : > { %v1713_v31 = vmul.f32 %v1681_v47, %v5166_v1  ;;  %v1720_v3 = vmul.f32 %v1688_v53, %v5169_v54  ;;  %v5171_v14 = vld [vmem:[#allocation46_spill] sm:$0xff]  ;;  %v5173_v25 = vld [vmem:[#allocation39_spill] sm:$0xff]  ;;  %v5178_v63 = vld [vmem:[#allocation68_spill] sm:$0xff] }
 0x2c7   : > { %v1719_v60 = vmul.f32 %v1687_v0, %v5171_v14  ;;  %v1721_v47 = vmul.f32 %v1689_v48, %v5173_v25  ;;  %v5176_v19 = vld [vmem:[#allocation43_spill] sm:$0xff]  ;;  %v5180_v38 = vld [vmem:[#allocation93_spill] sm:$0xff] }
 0x2c8   : > { %v5186_v14 = vld [vmem:[#allocation91_spill] sm:$0xff] }
 0x2cb   : > { %1878 = vadd.xlane.f32.xlu0 %v1689_v48  ;;  %1876 = vadd.xlane.f32.xlu2 %v1688_v53  ;;  %v1693_v48 = vmul.f32 %v4577_v42, %v4473_v35 }
 0x2cc   : > { %1874 = vadd.xlane.f32.xlu1 %v1687_v0  ;;  %v5177_v0 = vld [vmem:[#allocation59_spill] sm:$0xff] }
 0x2d3   : > { %1738 = vadd.xlane.f32.xlu0 %v1705_v4  ;;  %1882 = vadd.xlane.f32.xlu2 %v1691_v16  ;;  %v1717_v4 = vmul.f32 %v1685_v29, %v5165_v61  ;;  %v5181_v61 = vld [vmem:[#allocation94_spill] sm:$0xff] }
 0x2d4   : > { %1880 = vadd.xlane.f32.xlu1 %v1690_v62 }
 0x2db   : > { %1744 = vadd.xlane.f32.xlu0 %v1708_v43  ;;  %1736 = vadd.xlane.f32.xlu2 %v1704_v18  ;;  %v5167_v43 = vld [vmem:[#allocation25_spill] sm:$0xff]  ;;  %v1716_v18 = vmul.f32 %v1684_v52, %v5168_v12  ;;  %v5174_v52 = vld [vmem:[#allocation52_spill] sm:$0xff] }
 0x2dc   : > { %1740 = vadd.xlane.f32.xlu1 %v1706_v49  ;;  %v1715_v51 = vmul.f32 %v1683_v9, %v5167_v43  ;;  %v1718_v49 = vmul.f32 %v1686_v55, %v5170_v22  ;;  %v4666_v9 = vmul.f32 %v4577_v42, %v4479_v59  ;;  %v1722_v53 = vmul.f32 %v1690_v62, %v5174_v52  ;;  %v5183_v42 = vld [vmem:[#allocation65_spill] sm:$0xff] }
 0x2dd   : > { %v1729_v59 = vmul.f32 %v4599_v57, %v5178_v63  ;;  %v1728_v43 = vmul.f32 %v4607_v8, %v5183_v42 }
 0x2e3   : > { %1750 = vadd.xlane.f32.xlu0 %v1711_v40  ;;  %1742 = vadd.xlane.f32.xlu2 %v1707_v2  ;;  %v5172_v40 = vld [vmem:[#allocation61_spill] sm:$0xff]  ;;  %v5175_v2 = vld [vmem:[#allocation66_spill] sm:$0xff] }
 0x2e4   : > { %1746 = vadd.xlane.f32.xlu1 %v1709_v13  ;;  %v1723_v29 = vmul.f32 %v1691_v16, %v5172_v40  ;;  %v1726_v55 = vmul.f32 %v4666_v9, %v5175_v2  ;;  %v1724_v13 = vmul.f32 %v4582_v44, %v5176_v19  ;;  %v1725_v16 = vmul.f32 %v1693_v48, %v5177_v0  ;;  %v5190_v19 = vld [vmem:[#allocation71_spill] sm:$0xff]  ;;  %v5191_v0 = vld [vmem:[#allocation62_spill] sm:$0xff] }
 0x2eb   : > { %1756 = vadd.xlane.f32.xlu0 %v1714_v28  ;;  %1748 = vadd.xlane.f32.xlu2 %v1710_v15  ;;  %v5179_v28 = vld [vmem:[#allocation51_spill] sm:$0xff] }
 0x2ec   : > { %1752 = vadd.xlane.f32.xlu1 %v1712_v50  ;;  %v1727_v62 = vmul.f32 %v4586_v58, %v5179_v28 }
 0x2f3   : > { %1762 = vadd.xlane.f32.xlu0 %v1717_v4  ;;  %1754 = vadd.xlane.f32.xlu2 %v1713_v31  ;;  %v5182_v31 = vld [vmem:[#allocation95_spill] sm:$0xff] }
 0x2f4   : > { %1758 = vadd.xlane.f32.xlu1 %v1715_v51  ;;  %v5184_v51 = vld [vmem:[#allocation70_spill] sm:$0xff] }
 0x2f5   : > { %v1732_v12 = vmul.f32 %v4611_v20, %v5184_v51 }
 0x2fb   : > { %1760 = vadd.xlane.f32.xlu2 %v1716_v18  ;;  %1768 = vadd.xlane.f32.xlu0 %v1720_v3  ;;  %v5185_v18 = vld [vmem:[#allocation56_spill] sm:$0xff] }
 0x2fc   : > { %1764 = vadd.xlane.f32.xlu1 %v1718_v49  ;;  %v1730_v54 = vmul.f32 %v4603_v33, %v5185_v18 }
 0x303   : > { %1766 = vadd.xlane.f32.xlu2 %v1719_v60  ;;  %1774 = vadd.xlane.f32.xlu0 %v1723_v29  ;;  %v5187_v29 = vld [vmem:[#allocation92_spill] sm:$0xff] }
 0x304   : > { %1770 = vadd.xlane.f32.xlu1 %v1721_v47 }
 0x30b   : > { %1772 = vadd.xlane.f32.xlu2 %v1722_v53  ;;  %1780 = vadd.xlane.f32.xlu0 %v1726_v55  ;;  %v5189_v53 = vld [vmem:[#allocation67_spill] sm:$0xff] }
 0x30c   : > { %1776 = vadd.xlane.f32.xlu1 %v1724_v13  ;;  %v1731_v2 = vmul.f32 %v4619_v32, %v5189_v53  ;;  %v1735_v13 = vmul.f32 %v4623_v27, %v5190_v19 }
 0x313   : > { %1778 = vadd.xlane.f32.xlu2 %v1725_v16  ;;  %1786 = vadd.xlane.f32.xlu0 %v1729_v59  ;;  %v1733_v16 = vmul.f32 %v4615_v41, %v5191_v0 }
 0x314   : > { %1782 = vadd.xlane.f32.xlu1 %v1727_v62 }
 0x316   : > { %v1849_v34 = vpop.xlane.xlu0 %1848  ;;  %v1847_v15 = vpop.xlane.xlu2 %1846 }
 0x317   : > { %v1910_v50 = vsub.f32 %v5180_v38, %v1849_v34  ;;  %v1909_v4 = vsub.f32 %v5181_v61, %v1847_v15  ;;  %v1845_v1 = vpop.xlane.xlu1 %1844 }
 0x318   : > { %v1908_v35 = vsub.f32 %v5182_v31, %v1845_v1 }
 0x319   : > { %v4683_v55 = vmax.f32 %v1910_v50, 0.0   ;;  %v4685_v15 = vmax.f32 %v1909_v4, 0.0   ;;  %v5192_v50 = vld [vmem:[#allocation69_spill] sm:$0xff] }
 0x31a   : > { %v4691_v61 = vmax.f32 %v1908_v35, 0.0   ;;  %v1734_v4 = vmul.f32 %v4631_v45, %v5192_v50 }
 0x31b   : > { %1784 = vadd.xlane.f32.xlu2 %v1728_v43  ;;  %1792 = vadd.xlane.f32.xlu0 %v1732_v12 }
 0x31c   : > { %1788 = vadd.xlane.f32.xlu1 %v1730_v54 }
 0x31e   : > { %v1855_v3 = vpop.xlane.xlu0 %1854  ;;  %v1853_v22 = vpop.xlane.xlu2 %1852 }
 0x31f   : > { %v1913_v49 = vsub.f32 %v2926_v6, %v1855_v3  ;;  %v1912_v60 = vsub.f32 %v5186_v14, %v1853_v22  ;;  %v1851_v40 = vpop.xlane.xlu1 %1850 }
 0x320   : > { %v1911_v25 = vsub.f32 %v5187_v29, %v1851_v40  ;;  %v5195_v29 = vld [vmem:[#allocation90_spill] sm:$0xff] }
 0x321   : > { %v4698_v6 = vmax.f32 %v1913_v49, 0.0   ;;  %v4700_v47 = vmax.f32 %v1912_v60, 0.0   ;;  %v5193_v49 = vld [vmem:[#allocation88_spill] sm:$0xff]  ;;  %v5194_v60 = vld [vmem:[#allocation89_spill] sm:$0xff] }
 0x322   : > { %v4706_v35 = vmax.f32 %v1911_v25, 0.0  }
 0x323   : > { %v5188_v52 = vmov %v4700_v47  ;;  %1790 = vadd.xlane.f32.xlu2 %v1731_v2  ;;  %1798 = vadd.xlane.f32.xlu0 %v1735_v13  ;;  %v5196_v47 = vld [vmem:[#allocation86_spill] sm:$0xff]  ;;  %v5197_v2 = vld [vmem:[#allocation87_spill] sm:$0xff] }
 0x324   : > { %1794 = vadd.xlane.f32.xlu1 %v1733_v16 }
 0x326   : > { %v1861_v63 = vpop.xlane.xlu0 %1860  ;;  %v1859_v59 = vpop.xlane.xlu2 %1858 }
 0x327   : > { %v1916_v28 = vsub.f32 %v2914_v17, %v1861_v63  ;;  %v1915_v62 = vsub.f32 %v2918_v56, %v1859_v59  ;;  %v1857_v34 = vpop.xlane.xlu1 %1856 }
 0x328   : > { %v1914_v38 = vsub.f32 %v2922_v21, %v1857_v34 }
 0x329   : > { %v4713_v17 = vmax.f32 %v1916_v28, 0.0   ;;  %v4715_v56 = vmax.f32 %v1915_v62, 0.0  }
 0x32a   : > { %v4719_v21 = vmax.f32 %v1914_v38, 0.0  }
 0x32b   : > { %1796 = vadd.xlane.f32.xlu2 %v1734_v4  ;;  %1884 = vadd.xlane.f32.xlu0 %v4582_v44 }
 0x32c   : > { %1886 = vadd.xlane.f32.xlu1 %v1693_v48 }
 0x32e   : > { %v1867_v1 = vpop.xlane.xlu0 %1866  ;;  %v1865_v31 = vpop.xlane.xlu2 %1864 }
 0x32f   : > { %v1919_v42 = vsub.f32 %v2902_v5, %v1867_v1  ;;  %v1918_v43 = vsub.f32 %v2906_v11, %v1865_v31  ;;  %v1863_v51 = vpop.xlane.xlu1 %1862 }
 0x330   : > { %v1917_v12 = vsub.f32 %v2910_v37, %v1863_v51 }
 0x331   : > { %v4725_v5 = vmax.f32 %v1919_v42, 0.0   ;;  %v4727_v11 = vmax.f32 %v1918_v43, 0.0  }
 0x332   : > { %v4729_v37 = vmax.f32 %v1917_v12, 0.0  }
 0x333   : > { %1888 = vadd.xlane.f32.xlu2 %v4666_v9  ;;  %1890 = vadd.xlane.f32.xlu0 %v4586_v58 }
 0x334   : > { %1892 = vadd.xlane.f32.xlu1 %v4607_v8 }
 0x336   : > { %v1873_v44 = vpop.xlane.xlu0 %1872  ;;  %v1871_v48 = vpop.xlane.xlu2 %1870 }
 0x337   : > { %v1922_v18 = vsub.f32 %v2890_v30, %v1873_v44  ;;  %v1921_v54 = vsub.f32 %v2894_v10, %v1871_v48  ;;  %v1869_v3 = vpop.xlane.xlu1 %1868 }
 0x338   : > { %v1920_v22 = vsub.f32 %v2898_v7, %v1869_v3 }
 0x339   : > { %v4737_v30 = vmax.f32 %v1922_v18, 0.0   ;;  %v4739_v10 = vmax.f32 %v1921_v54, 0.0  }
 0x33a   : > { %v4741_v7 = vmax.f32 %v1920_v22, 0.0  }
 0x33b   : > { %1894 = vadd.xlane.f32.xlu2 %v4599_v57  ;;  %1896 = vadd.xlane.f32.xlu0 %v4603_v33 }
 0x33c   : > { %1898 = vadd.xlane.f32.xlu1 %v4619_v32 }
 0x33e   : > { %v1879_v58 = vpop.xlane.xlu0 %1878  ;;  %v1877_v8 = vpop.xlane.xlu2 %1876 }
 0x33f   : > { %v1875_v9 = vpop.xlane.xlu1 %1874  ;;  %v1925_v14 = vsub.f32 %v5193_v49, %v1879_v58  ;;  %v1924_v40 = vsub.f32 %v5194_v60, %v1877_v8 }
 0x340   : > { %v1923_v25 = vsub.f32 %v5195_v29, %v1875_v9 }
 0x341   : > { %v4749_v49 = vmax.f32 %v1925_v14, 0.0   ;;  %v4751_v60 = vmax.f32 %v1924_v40, 0.0  }
 0x342   : > { %v4753_v13 = vmax.f32 %v1923_v25, 0.0  }
 0x343   : > { %1900 = vadd.xlane.f32.xlu2 %v4611_v20  ;;  %1902 = vadd.xlane.f32.xlu0 %v4615_v41 }
 0x344   : > { %1904 = vadd.xlane.f32.xlu1 %v4631_v45 }
 0x346   : > { %v1739_v57 = vpop.xlane.xlu0 %1738  ;;  %v1883_v33 = vpop.xlane.xlu2 %1882 }
 0x347   : > { %v1881_v32 = vpop.xlane.xlu1 %1880  ;;  %v1927_v53 = vsub.f32 %v5196_v47, %v1883_v33 }
 0x348   : > { %v1926_v19 = vsub.f32 %v5197_v2, %v1881_v32 }
 0x349   : > { %v4760_v0 = vmax.f32 %v1927_v53, 0.0  }
 0x34a   : > { %v4762_v25 = vmax.f32 %v1926_v19, 0.0  }
 0x34b   : > { %1906 = vadd.xlane.f32.xlu2 %v4623_v27 }
 0x34e   : > { %v1745_v16 = vpop.xlane.xlu0 %1744  ;;  %v1737_v63 = vpop.xlane.xlu2 %1736 }
 0x34f   : > { %v1741_v20 = vpop.xlane.xlu1 %1740  ;;  %v1800_v59 = vadd.f32 %v1739_v57, %v1737_v63 }
 0x351   : > { %v1801_v41 = vadd.f32 %v1800_v59, %v1741_v20 }
 0x356   : > { %v1751_v28 = vpop.xlane.xlu0 %1750  ;;  %v1743_v45 = vpop.xlane.xlu2 %1742 }
 0x357   : > { %v1747_v62 = vpop.xlane.xlu1 %1746  ;;  %v1802_v34 = vadd.f32 %v1801_v41, %v1743_v45 }
 0x359   : > { %v1803_v38 = vadd.f32 %v1802_v34, %v1745_v16 }
 0x35b   : > { %v1804_v50 = vadd.f32 %v1803_v38, %v1747_v62  ;;  %v5198_v62 = vld [vmem:[#allocation97_spill] sm:$0xff] }
 0x35e   : > { %v1757_v4 = vpop.xlane.xlu0 %1756  ;;  %v1749_v1 = vpop.xlane.xlu2 %1748 }
 0x35f   : > { %v1753_v31 = vpop.xlane.xlu1 %1752  ;;  %v1805_v42 = vadd.f32 %v1804_v50, %v1749_v1 }
 0x361   : > { %v1806_v43 = vadd.f32 %v1805_v42, %v1751_v28 }
 0x363   : > { %v1807_v51 = vadd.f32 %v1806_v43, %v1753_v31 }
 0x366   : > { %v1763_v12 = vpop.xlane.xlu0 %1762  ;;  %v1755_v44 = vpop.xlane.xlu2 %1754 }
 0x367   : > { %v1759_v27 = vpop.xlane.xlu1 %1758  ;;  %v1808_v48 = vadd.f32 %v1807_v51, %v1755_v44 }
 0x369   : > { %v1809_v18 = vadd.f32 %v1808_v48, %v1757_v4 }
 0x36b   : > { %v1810_v54 = vadd.f32 %v1809_v18, %v1759_v27 }
 0x36e   : > { %v1761_v3 = vpop.xlane.xlu2 %1760  ;;  %v1769_v22 = vpop.xlane.xlu0 %1768 }
 0x36f   : > { %v1765_v58 = vpop.xlane.xlu1 %1764  ;;  %v1811_v8 = vadd.f32 %v1810_v54, %v1761_v3 }
 0x371   : > { %v1812_v9 = vadd.f32 %v1811_v8, %v1763_v12 }
 0x373   : > { %v1813_v14 = vadd.f32 %v1812_v9, %v1765_v58 }
 0x376   : > { %v1767_v40 = vpop.xlane.xlu2 %1766  ;;  %v1775_v29 = vpop.xlane.xlu0 %1774 }
 0x377   : > { %v1771_v57 = vpop.xlane.xlu1 %1770  ;;  %v1814_v33 = vadd.f32 %v1813_v14, %v1767_v40 }
 0x378   : > { %v1821_v53 = vadd.f32 %v1771_v57, %v1769_v22 }
 0x379   : > { %v1815_v32 = vrot.slane %v1814_v33, 4 }
 0x37b   : > { %v1816_v47 = vadd.f32 %v1815_v32, %v1814_v33  ;;  %v5200_v33 = vld [vmem:[#allocation85_spill] sm:$0xff] }
 0x37d   : > { %v1817_v2 = vrot.slane %v1816_v47, 2 }
 0x37e   : > { %v1773_v19 = vpop.xlane.xlu2 %1772  ;;  %v1781_v16 = vpop.xlane.xlu0 %1780 }
 0x37f   : > { %v1818_v63 = vadd.f32 %v1817_v2, %v1816_v47  ;;  %v1777_v20 = vpop.xlane.xlu1 %1776  ;;  %v1822_v59 = vadd.f32 %v1821_v53, %v1773_v19  ;;  %v5201_v47 = vld [vmem:[#allocation84_spill] sm:$0xff] }
 0x381   : > { %v1819_v41 = vrot.slane %v1818_v63, 1  ;;  %v1823_v28 = vadd.f32 %v1822_v59, %v1775_v29 }
 0x383   : > { %v1820_v45 = vadd.f32 %v1819_v41, %v1818_v63  ;;  %v1824_v38 = vadd.f32 %v1823_v28, %v1777_v20  ;;  %v5202_v28 = vld [vmem:[#allocation83_spill] sm:$0xff] }
 0x385   : > { %v4766_v48 = vadd.f32 %v5198_v62, %v1820_v45   ;;  %v5203_v62 = vld [vmem:[#allocation82_spill] sm:$0xff] }
 0x386   : > { %v1779_v50 = vpop.xlane.xlu2 %1778  ;;  %v1787_v4 = vpop.xlane.xlu0 %1786 }
 0x387   : > { %v5199_v34 = vmov %v4766_v48  ;;  %v1783_v1 = vpop.xlane.xlu1 %1782  ;;  %v1825_v31 = vadd.f32 %v1824_v38, %v1779_v50  ;;  %v5204_v50 = vld [vmem:[#allocation81_spill] sm:$0xff] }
 0x388   :  { %1980 = vst [vmem:[#allocation5] sm:$0xff] (%p4784_p0), %v5199_v34 }
 0x389   : > { %v1826_v42 = vadd.f32 %v1825_v31, %v1781_v16 }
 0x38b   : > { %v1827_v43 = vadd.f32 %v1826_v42, %v1783_v1 }
 0x38e   : > { %v1785_v51 = vpop.xlane.xlu2 %1784  ;;  %v1793_v12 = vpop.xlane.xlu0 %1792 }
 0x38f   : > { %v1789_v44 = vpop.xlane.xlu1 %1788  ;;  %v1828_v27 = vadd.f32 %v1827_v43, %v1785_v51 }
 0x391   : > { %v1829_v18 = vadd.f32 %v1828_v27, %v1787_v4 }
 0x393   : > { %v1830_v54 = vadd.f32 %v1829_v18, %v1789_v44  ;;  %v5205_v44 = vld [vmem:[#allocation96_spill] sm:$0xff] }
 0x396   : > { %v1791_v3 = vpop.xlane.xlu2 %1790  ;;  %v1799_v22 = vpop.xlane.xlu0 %1798 }
 0x397   : > { %v1795_v58 = vpop.xlane.xlu1 %1794  ;;  %v1831_v8 = vadd.f32 %v1830_v54, %v1791_v3 }
 0x399   : > { %v1832_v9 = vadd.f32 %v1831_v8, %v1793_v12  ;;  %v5207_v8 = vld [vmem:[#allocation79_spill] sm:$0xff] }
 0x39b   : > { %v1833_v14 = vadd.f32 %v1832_v9, %v1795_v58 }
 0x39e   : > { %v1797_v48 = vpop.xlane.xlu2 %1796  ;;  %v1885_v40 = vpop.xlane.xlu0 %1884 }
 0x39f   : > { %v1887_v29 = vpop.xlane.xlu1 %1886  ;;  %v1834_v57 = vadd.f32 %v1833_v14, %v1797_v48  ;;  %v1928_v32 = vsub.f32 %v5200_v33, %v1885_v40  ;;  %v5208_v33 = vld [vmem:[#allocation77_spill] sm:$0xff] }
 0x3a0   : > { %v1929_v53 = vsub.f32 %v5201_v47, %v1887_v29 }
 0x3a1   : > { %v1835_v2 = vadd.f32 %v1834_v57, %v1799_v22  ;;  %v1960_v51 = vmax.f32 %v1928_v32, 0.0   ;;  %v5206_v22 = vld [vmem:[#allocation80_spill] sm:$0xff] }
 0x3a2   : > { %v1961_v3 = vmax.f32 %v1929_v53, 0.0  }
 0x3a3   : > { %v1836_v19 = vrot.slane %v1835_v2, 4 }
 0x3a5   : > { %v1837_v16 = vadd.f32 %v1836_v19, %v1835_v2 }
 0x3a6   : > { %v1889_v63 = vpop.xlane.xlu2 %1888  ;;  %v1891_v20 = vpop.xlane.xlu0 %1890 }
 0x3a7   : > { %v1838_v59 = vrot.slane %v1837_v16, 2  ;;  %v1893_v41 = vpop.xlane.xlu1 %1892  ;;  %v1930_v45 = vsub.f32 %v5202_v28, %v1889_v63  ;;  %v1931_v38 = vsub.f32 %v5203_v62, %v1891_v20 }
 0x3a8   : > { %v1932_v4 = vsub.f32 %v5204_v50, %v1893_v41 }
 0x3a9   : > { %v1839_v1 = vadd.f32 %v1838_v59, %v1837_v16  ;;  %v1962_v54 = vmax.f32 %v1930_v45, 0.0   ;;  %v1963_v63 = vmax.f32 %v1931_v38, 0.0  }
 0x3aa   : > { %v1964_v47 = vmax.f32 %v1932_v4, 0.0   ;;  %v5210_v4 = vmov %v4595_v46 }
 0x3ab   : > { %v1840_v31 = vrot.slane %v1839_v1, 1 }
 0x3ad   : > { %v1841_v42 = vadd.f32 %v1840_v31, %v1839_v1 }
 0x3ae   : > { %v1895_v43 = vpop.xlane.xlu2 %1894  ;;  %v1897_v12 = vpop.xlane.xlu0 %1896 }
 0x3af   : > { %v1843_v27 = vadd.f32 %v5205_v44, %v1841_v42   ;;  %v1899_v18 = vpop.xlane.xlu1 %1898  ;;  %v1933_v58 = vsub.f32 %v5206_v22, %v1895_v43  ;;  %v1934_v9 = vsub.f32 %v5207_v8, %v1897_v12 }
 0x3b0   : > { %v1935_v14 = vsub.f32 %v5143_v26, %v1899_v18 }
 0x3b1   : > { %v1965_v32 = vmax.f32 %v1933_v58, 0.0   ;;  %v1966_v48 = vmax.f32 %v1934_v9, 0.0   ;;  %1981 = vst [vmem:[#allocation5 + $0x8] sm:$0xff] (%p4784_p0), %v1843_v27 }
 0x3b2   : > { %v1967_v9 = vmax.f32 %v1935_v14, 0.0   ;;  %v5215_v14 = vmov %v1843_v27  ;;  %1994 = dma.vmem_to_hbm [thread:$0]  (%p4784_p0), %s1987_s6, 256, %s1989_s4, [#allocation3], %s2965_s7, %s2965_s7, %s2966_s8  }
 0x3b3   : > { %v5212_v46 = vmov %v1966_v48  ;;  %v5216_v48 = vmov %v5199_v34 }
 0x3b6   : > { %v1901_v40 = vpop.xlane.xlu2 %1900  ;;  %v1903_v29 = vpop.xlane.xlu0 %1902 }
 0x3b7   : > { %v1905_v57 = vpop.xlane.xlu1 %1904  ;;  %v1936_v53 = vsub.f32 %v5208_v33, %v1901_v40  ;;  %v1937_v2 = vsub.f32 %v5146_v39, %v1903_v29 }
 0x3b8   : > { %v1938_v19 = vsub.f32 %v5149_v24, %v1905_v57 }
 0x3b9   : > { %v1968_v39 = vmax.f32 %v1936_v53, 0.0   ;;  %v1969_v50 = vmax.f32 %v1937_v2, 0.0  }
 0x3ba   : > { %v1970_v42 = vmax.f32 %v1938_v19, 0.0   ;;  %v5211_v19 = vmov %v4547_v23  ;;  %v5213_v23 = vmov %v4760_v0 }
 0x3bd   :  { %1160 = sbr.rel (!%p4784_p0) target bundleno = 421 (0x1a5), region = 43 }
 0x3be   : > { %v1907_v16 = vpop.xlane.xlu2 %1906 }
 0x3bf   : > { %v1939_v20 = vsub.f32 %v5150_v36, %v1907_v16 }
 0x3c1   : > { %v1971_v28 = vmax.f32 %v1939_v20, 0.0   ;;  %v5214_v20 = vmov %v5188_v52 }
 0x3c2   :  { %2810 = dma.done.wait [#allocation3], 256  }
 0x3c3   :  { %2811 = vsyncadd [#allocation3], 4294967040 }
 0x3c4   :  { %1999 = vsyncpa [#allocation3], 1 }
 0x3c5   :  { %2000 = vsyncpa [#allocation4], 1 }

</bundles_post_ra>
